<compile_context>
chip_gen: v5e
topology: v5e:2x2
jax: 0.10.0
libtpu: 0.0.40
codegen_flags: <defaults>
</compile_context>

<pallas_src>
import functools

import jax
import jax.numpy as jnp
import numpy as np
from jax import lax
from jax.experimental import pallas as pl
from jax.experimental.pallas import tpu as pltpu

_SUB = 8      # sublane quantum
_LANE = 128   # lane quantum


def _rup(x, m):
    return (x + m - 1) // m * m


# ----------------------------------------------------------------------------- slab layout

def _make_layout(*, ssd, human_dim, H, hidden, action_dim):
    """Row offsets of each parameter block inside the two packed slabs."""
    D = ssd + human_dim
    DP = _rup(D, _SUB)                               # full-D input-weight row block
    HP = _rup(H, _LANE)                              # per-gate lane block width
    GW = 4 * HP                                      # lstm slab width (4 gates)
    FP = _rup(max(hidden, 2 * action_dim), _LANE)    # mlp slab width

    r = 0
    wih_r = r;   r += DP                             # (D, GW)  rows ssd..D-1 valid (human feats)
    whh_r = r;   r += _rup(H, _SUB)                  # (H, GW)
    blstm_r = r; r += _SUB                           # (1, GW)  (b_ih + b_hh)
    lstm_rows = r

    r = 0
    w1s_r = r; r += DP                               # (D, hidden)  rows 0..ssd-1 valid (self feats)
    w1h_r = r; r += _rup(H, _SUB)                    # (H, hidden)
    b1_r = r;  r += _SUB
    w2_r = r;  r += _rup(hidden, _SUB)               # (hidden, hidden)
    b2_r = r;  r += _SUB
    wh_r = r;  r += _rup(hidden, _SUB)               # (hidden, 2*action_dim) fused mean|log_std
    bh_r = r;  r += _SUB
    mlp_rows = r

    return dict(D=D, HP=HP, GW=GW, FP=FP,
                wih_r=wih_r, whh_r=whh_r, blstm_r=blstm_r, lstm_rows=lstm_rows,
                w1s_r=w1s_r, w1h_r=w1h_r, b1_r=b1_r, w2_r=w2_r, b2_r=b2_r,
                wh_r=wh_r, bh_r=bh_r, mlp_rows=mlp_rows)


# ----------------------------------------------------------------------------- kernel

def _policy_kernel(state_ref,    # (bb, seq, D)  raw state block, D = ssd + human_dim
                   lstm_ref,     # (lstm_rows, 4*HP)  packed LSTM weights (per-gate blocks)
                   mlp_ref,      # (mlp_rows, FP)     packed MLP / head weights
                   out_ref,      # out: (bb, 2*action_dim)  [mean | clamped log_std]
                   *, H, hidden, action_dim, lay):
    Bb, seq, D = state_ref.shape
    HP = lay["HP"]
    A = action_dim

    # ---- hoisted LSTM input projection: independent of h, off the serial chain ----
    # Full-D weight rows: self-state rows are zero, so multiplying the whole state row is
    # exactly x_t(human) @ W_ih^T with no lane-unaligned slicing of the state.
    wih = lstm_ref[lay["wih_r"]:lay["wih_r"] + D, :]              # (D, 4*HP)
    blstm = lstm_ref[lay["blstm_r"]:lay["blstm_r"] + 1, :]        # (1, 4*HP)
    gx = [jnp.dot(state_ref[:, t, :], wih, preferred_element_type=jnp.float32) + blstm
          for t in range(seq)]

    # ---- fully unrolled recurrence: only h @ W_hh stays on the serial chain --------
    whh = lstm_ref[lay["whh_r"]:lay["whh_r"] + H, :]              # (H, 4*HP)
    h = jnp.zeros((Bb, H), jnp.float32)
    c = jnp.zeros((Bb, H), jnp.float32)
    for t in range(seq):
        gates = gx[t] + jnp.dot(h, whh, preferred_element_type=jnp.float32)  # (Bb, 4*HP)
        # per-gate slices start at multiples of 128 lanes -> no lane rotation.
        i_g = jax.nn.sigmoid(gates[:, 0 * HP:0 * HP + H])
        f_g = jax.nn.sigmoid(gates[:, 1 * HP:1 * HP + H])
        g_g = jnp.tanh(gates[:, 2 * HP:2 * HP + H])
        o_g = jax.nn.sigmoid(gates[:, 3 * HP:3 * HP + H])
        c = f_g * c + i_g * g_g
        h = o_g * jnp.tanh(c)

    # ---- joint-state MLP + fused mean/log_std head ---------------------------------
    # cat([self_state, hn]) @ W1^T == x0 @ W1s + hn @ W1h; W1s rows for human features are
    # zero, so the whole t=0 state row is used with no lane slicing.
    x0 = state_ref[:, 0, :]                                        # (Bb, D)
    w1s = mlp_ref[lay["w1s_r"]:lay["w1s_r"] + D, :hidden]          # (D, hidden)
    w1h = mlp_ref[lay["w1h_r"]:lay["w1h_r"] + H, :hidden]          # (H, hidden)
    b1 = mlp_ref[lay["b1_r"]:lay["b1_r"] + 1, :hidden]             # (1, hidden)
    x1 = jnp.maximum(
        jnp.dot(x0, w1s, preferred_element_type=jnp.float32)
        + jnp.dot(h, w1h, preferred_element_type=jnp.float32)
        + b1, 0.0)

    w2 = mlp_ref[lay["w2_r"]:lay["w2_r"] + hidden, :hidden]        # (hidden, hidden)
    b2 = mlp_ref[lay["b2_r"]:lay["b2_r"] + 1, :hidden]             # (1, hidden)
    x2 = jnp.maximum(
        jnp.dot(x1, w2, preferred_element_type=jnp.float32) + b2, 0.0)

    wh = mlp_ref[lay["wh_r"]:lay["wh_r"] + hidden, :2 * A]         # (hidden, 2A)
    bh = mlp_ref[lay["bh_r"]:lay["bh_r"] + 1, :2 * A]              # (1, 2A)
    head = jnp.dot(x2, wh, preferred_element_type=jnp.float32) + bh  # (Bb, 2A)

    # fused output: lanes [0, A) = mean (passthrough), lanes [A, 2A) = clamped log_std.
    lane = lax.broadcasted_iota(jnp.int32, (Bb, 2 * A), 1)
    out_ref[...] = jnp.where(lane >= A, jnp.clip(head, -20.0, 2.0), head)


# ----------------------------------------------------------------------------- wrapper

@functools.partial(jax.jit, static_argnames=("ssd", "human_dim", "H", "hidden", "action_dim"))
def policy_forward(state, lstm_slab, mlp_slab, *, ssd, human_dim, H, hidden, action_dim):
    """state: (B, n_humans, ssd + human_dim) float32 -> (mean, log_std), each (B, action_dim).

    Callers should batch (B >= 8, ideally 128+) whenever possible: the kernel is essentially
    flat in B and per-call fixed overhead dominates at tiny batch sizes.
    """
    B, seq, D = state.shape
    lay = _make_layout(ssd=ssd, human_dim=human_dim, H=H, hidden=hidden, action_dim=action_dim)
    assert D == lay["D"], "state feature dim must equal self_state_dim + human_dim"
    assert lstm_slab.shape == (lay["lstm_rows"], lay["GW"]), "lstm_slab packed for different dims"
    assert mlp_slab.shape == (lay["mlp_rows"], lay["FP"]), "mlp_slab packed for different dims"
    assert seq >= 1

    # Batch tiling: one grid step for small B (whole arrays resident, ~0.2 MiB VMEM);
    # a "parallel" batch axis only for large, divisible B so v7x can use both TensorCores.
    if B >= 256 and B % 128 == 0:
        bb = 128
    else:
        bb = B
    nb = B // bb

    kernel = functools.partial(_policy_kernel, H=H, hidden=hidden,
                               action_dim=action_dim, lay=lay)
    head = pl.pallas_call(
        kernel,
        out_shape=jax.ShapeDtypeStruct((B, 2 * action_dim), jnp.float32),
        grid=(nb,),
        in_specs=[
            pl.BlockSpec((bb, seq, D), lambda i: (i, 0, 0)),
            pl.BlockSpec((lay["lstm_rows"], lay["GW"]), lambda i: (0, 0)),
            pl.BlockSpec((lay["mlp_rows"], lay["FP"]), lambda i: (0, 0)),
        ],
        out_specs=pl.BlockSpec((bb, 2 * action_dim), lambda i: (i, 0)),
        compiler_params=pltpu.CompilerParams(dimension_semantics=("parallel",)),
    )(state, lstm_slab, mlp_slab)

    return head[:, :action_dim], head[:, action_dim:]


# ----------------------------------------------------------------------------- param init / pack

def init_raw_params(key, human_dim, action_dim, hidden, ssd, H):
    """PyTorch-layout parameters with the default uniform(-1/sqrt(fan), 1/sqrt(fan)) init."""
    ks = jax.random.split(key, 12)

    def u(k, shape, fan):
        bound = 1.0 / np.sqrt(fan)
        return jax.random.uniform(k, shape, jnp.float32, -bound, bound)

    return {
        "w_ih": u(ks[0], (4 * H, human_dim), H),       # nn.LSTM weight_ih_l0 (gate order i,f,g,o)
        "w_hh": u(ks[1], (4 * H, H), H),               # nn.LSTM weight_hh_l0
        "b_ih": u(ks[2], (4 * H,), H),
        "b_hh": u(ks[3], (4 * H,), H),
        "w1": u(ks[4], (hidden, ssd + H), ssd + H),    # linear1  (cat order: [self, hn])
        "b1": u(ks[5], (hidden,), ssd + H),
        "w2": u(ks[6], (hidden, hidden), hidden),
        "b2": u(ks[7], (hidden,), hidden),
        "wm": u(ks[8], (action_dim, hidden), hidden),  # mean_linear
        "bm": u(ks[9], (action_dim,), hidden),
        "wls": u(ks[10], (action_dim, hidden), hidden),  # log_std_linear
        "bls": u(ks[11], (action_dim,), hidden),
    }


def pack_params(raw, *, ssd, human_dim, H, hidden, action_dim):
    """Pack all parameters into two padded f32 slabs (done once, outside the hot path)."""
    lay = _make_layout(ssd=ssd, human_dim=human_dim, H=H, hidden=hidden, action_dim=action_dim)
    D, HP, GW, FP = lay["D"], lay["HP"], lay["GW"], lay["FP"]

    w_ih = np.asarray(raw["w_ih"], np.float32)           # (4H, human_dim), gate order i,f,g,o
    w_hh = np.asarray(raw["w_hh"], np.float32)           # (4H, H)
    b = np.asarray(raw["b_ih"], np.float32) + np.asarray(raw["b_hh"], np.float32)

    lstm = np.zeros((lay["lstm_rows"], GW), np.float32)
    for g in range(4):
        col = g * HP
        # full-D input rows: state feature j maps to row j; self-state rows (0..ssd-1) stay 0.
        lstm[lay["wih_r"] + ssd:lay["wih_r"] + D, col:col + H] = w_ih[g * H:(g + 1) * H, :].T
        lstm[lay["whh_r"]:lay["whh_r"] + H, col:col + H] = w_hh[g * H:(g + 1) * H, :].T
        lstm[lay["blstm_r"], col:col + H] = b[g * H:(g + 1) * H]

    w1 = np.asarray(raw["w1"], np.float32)
    mlp = np.zeros((lay["mlp_rows"], FP), np.float32)
    # full-D linear1 self-state rows: human-feature rows (ssd..D-1) stay 0.
    mlp[lay["w1s_r"]:lay["w1s_r"] + ssd, :hidden] = w1[:, :ssd].T
    mlp[lay["w1h_r"]:lay["w1h_r"] + H, :hidden] = w1[:, ssd:].T
    mlp[lay["b1_r"], :hidden] = np.asarray(raw["b1"], np.float32)
    mlp[lay["w2_r"]:lay["w2_r"] + hidden, :hidden] = np.asarray(raw["w2"], np.float32).T
    mlp[lay["b2_r"], :hidden] = np.asarray(raw["b2"], np.float32)
    mlp[lay["wh_r"]:lay["wh_r"] + hidden, 0:action_dim] = np.asarray(raw["wm"], np.float32).T
    mlp[lay["wh_r"]:lay["wh_r"] + hidden,
        action_dim:2 * action_dim] = np.asarray(raw["wls"], np.float32).T
    mlp[lay["bh_r"], 0:action_dim] = np.asarray(raw["bm"], np.float32)
    mlp[lay["bh_r"], action_dim:2 * action_dim] = np.asarray(raw["bls"], np.float32)

    return {"lstm_slab": jnp.asarray(lstm), "mlp_slab": jnp.asarray(mlp)}


# ----------------------------------------------------------------------------- pure-JAX reference

def reference_forward(state, raw, *, ssd):
    b, seq, _ = state.shape
    H = raw["w_hh"].shape[1]
    self_state = state[:, 0, :ssd]
    human = jnp.transpose(state[:, :, ssd:], (1, 0, 2))
    wih_t = raw["w_ih"].T
    whh_t = raw["w_hh"].T
    bsum = raw["b_ih"] + raw["b_hh"]

    def step(carry, x_t):
        h, c = carry
        gates = x_t @ wih_t + h @ whh_t + bsum
        i_g = jax.nn.sigmoid(gates[:, 0 * H:1 * H])
        f_g = jax.nn.sigmoid(gates[:, 1 * H:2 * H])
        g_g = jnp.tanh(gates[:, 2 * H:3 * H])
        o_g = jax.nn.sigmoid(gates[:, 3 * H:4 * H])
        c = f_g * c + i_g * g_g
        h = o_g * jnp.tanh(c)
        return (h, c), None

    (hn, _), _ = lax.scan(step,
                          (jnp.zeros((b, H), jnp.float32), jnp.zeros((b, H), jnp.float32)),
                          human)
    joint = jnp.concatenate([self_state, hn], axis=1)
    x = jax.nn.relu(joint @ raw["w1"].T + raw["b1"])
    x = jax.nn.relu(x @ raw["w2"].T + raw["b2"])
    mean = x @ raw["wm"].T + raw["bm"]
    log_std = jnp.clip(x @ raw["wls"].T + raw["bls"], -20.0, 2.0)
    return mean, log_std


# ----------------------------------------------------------------------------- main

if __name__ == "__main__":
    human_dim = 7
    action_dim = 2
    hidden_size = 32
    self_state_dim = 6
    lstm_hidden_dim = 32
    batch = 2            # kernel is ~flat in batch; callers should batch >= 8 when possible
    n_humans = 5         # LSTM sequence length

    key = jax.random.PRNGKey(0)
    k_param, k_state = jax.random.split(key)
    raw = init_raw_params(k_param, human_dim, action_dim, hidden_size,
                          self_state_dim, lstm_hidden_dim)
    packed = pack_params(raw, ssd=self_state_dim, human_dim=human_dim, H=lstm_hidden_dim,
                         hidden=hidden_size, action_dim=action_dim)

    state = jax.random.normal(
        k_state, (batch, n_humans, self_state_dim + human_dim), jnp.float32)

    mean, log_std = policy_forward(state, packed["lstm_slab"], packed["mlp_slab"],
                                   ssd=self_state_dim, human_dim=human_dim,
                                   H=lstm_hidden_dim, hidden=hidden_size,
                                   action_dim=action_dim)
    jax.block_until_ready((mean, log_std))

    mean_ref, log_std_ref = reference_forward(state, raw, ssd=self_state_dim)
    # Tolerance covers possible DEFAULT-precision (bf16-pass) vs full-f32 MXU differences
    # between the in-kernel dots and the XLA reference dots; layout/packing bugs would show
    # up as O(0.1-1) errors and still fail loudly.
    np.testing.assert_allclose(np.asarray(mean), np.asarray(mean_ref), rtol=5e-3, atol=5e-3)
    np.testing.assert_allclose(np.asarray(log_std), np.asarray(log_std_ref), rtol=5e-3, atol=5e-3)

    print("KERNEL_OK")
</pallas_src>

<mosaic_0001>
module attributes {stable_mosaic.version = 11 : i64} {
  func.func @_policy_kernel(%arg0: i32, %arg1: memref<2x5x13xf32, #tpu.memory_space<vmem>>, %arg2: memref<56x512xf32, #tpu.memory_space<vmem>>, %arg3: memref<136x128xf32, #tpu.memory_space<vmem>>, %arg4: memref<2x4xf32, #tpu.memory_space<vmem>>) attributes {dimension_semantics = [#tpu.dimension_semantics<parallel>], iteration_bounds = array<i64: 1>, scalar_prefetch = 0 : i64, scratch_operands = 0 : i64, tpu.core_type = #tpu.core_type<tc>, window_params = [{transform_indices = @transform_0, window_bounds = array<i64: 2, 5, 13>}, {pipeline_mode = #tpu.pipeline_mode<synchronous>, transform_indices = @transform_1, window_bounds = array<i64: 56, 512>}, {pipeline_mode = #tpu.pipeline_mode<synchronous>, transform_indices = @transform_2, window_bounds = array<i64: 136, 128>}, {transform_indices = @transform_3, window_bounds = array<i64: 2, 4>}]} {
    %c0 = arith.constant 0 : index
    %c0_0 = arith.constant 0 : index
    %0 = vector.load %arg2[%c0, %c0_0] : memref<56x512xf32, #tpu.memory_space<vmem>>, vector<13x512xf32>
    %c48 = arith.constant 48 : index
    %c0_1 = arith.constant 0 : index
    %1 = vector.load %arg2[%c48, %c0_1] : memref<56x512xf32, #tpu.memory_space<vmem>>, vector<1x512xf32>
    %c0_2 = arith.constant 0 : index
    %c0_3 = arith.constant 0 : index
    %c0_4 = arith.constant 0 : index
    %2 = vector.load %arg1[%c0_2, %c0_3, %c0_4] : memref<2x5x13xf32, #tpu.memory_space<vmem>>, vector<2x1x13xf32>
    %3 = vector.shape_cast %2 : vector<2x1x13xf32> to vector<2x13xf32>
    %cst = arith.constant dense<0.000000e+00> : vector<2x512xf32>
    %4 = tpu.matmul %3, %0, %cst {dimension_numbers = #tpu.dot_dimension_numbers<[1], [0], [0], [1], [0, 0, 1, 1], [], []>} : vector<2x13xf32>, vector<13x512xf32>, vector<2x512xf32> -> vector<2x512xf32>
    %5 = vector.broadcast %1 : vector<1x512xf32> to vector<2x512xf32>
    %6 = arith.addf %4, %5 : vector<2x512xf32>
    %c0_5 = arith.constant 0 : index
    %c1 = arith.constant 1 : index
    %c0_6 = arith.constant 0 : index
    %7 = vector.load %arg1[%c0_5, %c1, %c0_6] : memref<2x5x13xf32, #tpu.memory_space<vmem>>, vector<2x1x13xf32>
    %8 = vector.shape_cast %7 : vector<2x1x13xf32> to vector<2x13xf32>
    %cst_7 = arith.constant dense<0.000000e+00> : vector<2x512xf32>
    %9 = tpu.matmul %8, %0, %cst_7 {dimension_numbers = #tpu.dot_dimension_numbers<[1], [0], [0], [1], [0, 0, 1, 1], [], []>} : vector<2x13xf32>, vector<13x512xf32>, vector<2x512xf32> -> vector<2x512xf32>
    %10 = vector.broadcast %1 : vector<1x512xf32> to vector<2x512xf32>
    %11 = arith.addf %9, %10 : vector<2x512xf32>
    %c0_8 = arith.constant 0 : index
    %c2 = arith.constant 2 : index
    %c0_9 = arith.constant 0 : index
    %12 = vector.load %arg1[%c0_8, %c2, %c0_9] : memref<2x5x13xf32, #tpu.memory_space<vmem>>, vector<2x1x13xf32>
    %13 = vector.shape_cast %12 : vector<2x1x13xf32> to vector<2x13xf32>
    %cst_10 = arith.constant dense<0.000000e+00> : vector<2x512xf32>
    %14 = tpu.matmul %13, %0, %cst_10 {dimension_numbers = #tpu.dot_dimension_numbers<[1], [0], [0], [1], [0, 0, 1, 1], [], []>} : vector<2x13xf32>, vector<13x512xf32>, vector<2x512xf32> -> vector<2x512xf32>
    %15 = vector.broadcast %1 : vector<1x512xf32> to vector<2x512xf32>
    %16 = arith.addf %14, %15 : vector<2x512xf32>
    %c0_11 = arith.constant 0 : index
    %c3 = arith.constant 3 : index
    %c0_12 = arith.constant 0 : index
    %17 = vector.load %arg1[%c0_11, %c3, %c0_12] : memref<2x5x13xf32, #tpu.memory_space<vmem>>, vector<2x1x13xf32>
    %18 = vector.shape_cast %17 : vector<2x1x13xf32> to vector<2x13xf32>
    %cst_13 = arith.constant dense<0.000000e+00> : vector<2x512xf32>
    %19 = tpu.matmul %18, %0, %cst_13 {dimension_numbers = #tpu.dot_dimension_numbers<[1], [0], [0], [1], [0, 0, 1, 1], [], []>} : vector<2x13xf32>, vector<13x512xf32>, vector<2x512xf32> -> vector<2x512xf32>
    %20 = vector.broadcast %1 : vector<1x512xf32> to vector<2x512xf32>
    %21 = arith.addf %19, %20 : vector<2x512xf32>
    %c0_14 = arith.constant 0 : index
    %c4 = arith.constant 4 : index
    %c0_15 = arith.constant 0 : index
    %22 = vector.load %arg1[%c0_14, %c4, %c0_15] : memref<2x5x13xf32, #tpu.memory_space<vmem>>, vector<2x1x13xf32>
    %23 = vector.shape_cast %22 : vector<2x1x13xf32> to vector<2x13xf32>
    %cst_16 = arith.constant dense<0.000000e+00> : vector<2x512xf32>
    %24 = tpu.matmul %23, %0, %cst_16 {dimension_numbers = #tpu.dot_dimension_numbers<[1], [0], [0], [1], [0, 0, 1, 1], [], []>} : vector<2x13xf32>, vector<13x512xf32>, vector<2x512xf32> -> vector<2x512xf32>
    %25 = vector.broadcast %1 : vector<1x512xf32> to vector<2x512xf32>
    %26 = arith.addf %24, %25 : vector<2x512xf32>
    %c16 = arith.constant 16 : index
    %c0_17 = arith.constant 0 : index
    %27 = vector.load %arg2[%c16, %c0_17] : memref<56x512xf32, #tpu.memory_space<vmem>>, vector<32x512xf32>
    %cst_18 = arith.constant 0.000000e+00 : f32
    %28 = vector.broadcast %cst_18 : f32 to vector<2x32xf32>
    %cst_19 = arith.constant 0.000000e+00 : f32
    %29 = vector.broadcast %cst_19 : f32 to vector<2x32xf32>
    %cst_20 = arith.constant dense<0.000000e+00> : vector<2x512xf32>
    %30 = tpu.matmul %28, %27, %cst_20 {dimension_numbers = #tpu.dot_dimension_numbers<[1], [0], [0], [1], [0, 0, 1, 1], [], []>} : vector<2x32xf32>, vector<32x512xf32>, vector<2x512xf32> -> vector<2x512xf32>
    %31 = arith.addf %6, %30 : vector<2x512xf32>
    %32 = vector.extract_strided_slice %31 {offsets = [0, 0], sizes = [2, 32], strides = [1, 1]} : vector<2x512xf32> to vector<2x32xf32>
    %33 = arith.negf %32 : vector<2x32xf32>
    %34 = math.exp %33 : vector<2x32xf32>
    %cst_21 = arith.constant 1.000000e+00 : f32
    %35 = vector.broadcast %cst_21 : f32 to vector<2x32xf32>
    %36 = arith.addf %35, %34 : vector<2x32xf32>
    %37 = arith.divf %35, %36 : vector<2x32xf32>
    %38 = vector.extract_strided_slice %31 {offsets = [0, 128], sizes = [2, 32], strides = [1, 1]} : vector<2x512xf32> to vector<2x32xf32>
    %39 = arith.negf %38 : vector<2x32xf32>
    %40 = math.exp %39 : vector<2x32xf32>
    %cst_22 = arith.constant 1.000000e+00 : f32
    %41 = vector.broadcast %cst_22 : f32 to vector<2x32xf32>
    %42 = arith.addf %41, %40 : vector<2x32xf32>
    %43 = arith.divf %41, %42 : vector<2x32xf32>
    %44 = vector.extract_strided_slice %31 {offsets = [0, 256], sizes = [2, 32], strides = [1, 1]} : vector<2x512xf32> to vector<2x32xf32>
    %45 = math.tanh %44 : vector<2x32xf32>
    %46 = vector.extract_strided_slice %31 {offsets = [0, 384], sizes = [2, 32], strides = [1, 1]} : vector<2x512xf32> to vector<2x32xf32>
    %47 = arith.negf %46 : vector<2x32xf32>
    %48 = math.exp %47 : vector<2x32xf32>
    %cst_23 = arith.constant 1.000000e+00 : f32
    %49 = vector.broadcast %cst_23 : f32 to vector<2x32xf32>
    %50 = arith.addf %49, %48 : vector<2x32xf32>
    %51 = arith.divf %49, %50 : vector<2x32xf32>
    %52 = arith.mulf %43, %29 : vector<2x32xf32>
    %53 = arith.mulf %37, %45 : vector<2x32xf32>
    %54 = arith.addf %52, %53 : vector<2x32xf32>
    %55 = math.tanh %54 : vector<2x32xf32>
    %56 = arith.mulf %51, %55 : vector<2x32xf32>
    %cst_24 = arith.constant dense<0.000000e+00> : vector<2x512xf32>
    %57 = tpu.matmul %56, %27, %cst_24 {dimension_numbers = #tpu.dot_dimension_numbers<[1], [0], [0], [1], [0, 0, 1, 1], [], []>} : vector<2x32xf32>, vector<32x512xf32>, vector<2x512xf32> -> vector<2x512xf32>
    %58 = arith.addf %11, %57 : vector<2x512xf32>
    %59 = vector.extract_strided_slice %58 {offsets = [0, 0], sizes = [2, 32], strides = [1, 1]} : vector<2x512xf32> to vector<2x32xf32>
    %60 = arith.negf %59 : vector<2x32xf32>
    %61 = math.exp %60 : vector<2x32xf32>
    %cst_25 = arith.constant 1.000000e+00 : f32
    %62 = vector.broadcast %cst_25 : f32 to vector<2x32xf32>
    %63 = arith.addf %62, %61 : vector<2x32xf32>
    %64 = arith.divf %62, %63 : vector<2x32xf32>
    %65 = vector.extract_strided_slice %58 {offsets = [0, 128], sizes = [2, 32], strides = [1, 1]} : vector<2x512xf32> to vector<2x32xf32>
    %66 = arith.negf %65 : vector<2x32xf32>
    %67 = math.exp %66 : vector<2x32xf32>
    %cst_26 = arith.constant 1.000000e+00 : f32
    %68 = vector.broadcast %cst_26 : f32 to vector<2x32xf32>
    %69 = arith.addf %68, %67 : vector<2x32xf32>
    %70 = arith.divf %68, %69 : vector<2x32xf32>
    %71 = vector.extract_strided_slice %58 {offsets = [0, 256], sizes = [2, 32], strides = [1, 1]} : vector<2x512xf32> to vector<2x32xf32>
    %72 = math.tanh %71 : vector<2x32xf32>
    %73 = vector.extract_strided_slice %58 {offsets = [0, 384], sizes = [2, 32], strides = [1, 1]} : vector<2x512xf32> to vector<2x32xf32>
    %74 = arith.negf %73 : vector<2x32xf32>
    %75 = math.exp %74 : vector<2x32xf32>
    %cst_27 = arith.constant 1.000000e+00 : f32
    %76 = vector.broadcast %cst_27 : f32 to vector<2x32xf32>
    %77 = arith.addf %76, %75 : vector<2x32xf32>
    %78 = arith.divf %76, %77 : vector<2x32xf32>
    %79 = arith.mulf %70, %54 : vector<2x32xf32>
    %80 = arith.mulf %64, %72 : vector<2x32xf32>
    %81 = arith.addf %79, %80 : vector<2x32xf32>
    %82 = math.tanh %81 : vector<2x32xf32>
    %83 = arith.mulf %78, %82 : vector<2x32xf32>
    %cst_28 = arith.constant dense<0.000000e+00> : vector<2x512xf32>
    %84 = tpu.matmul %83, %27, %cst_28 {dimension_numbers = #tpu.dot_dimension_numbers<[1], [0], [0], [1], [0, 0, 1, 1], [], []>} : vector<2x32xf32>, vector<32x512xf32>, vector<2x512xf32> -> vector<2x512xf32>
    %85 = arith.addf %16, %84 : vector<2x512xf32>
    %86 = vector.extract_strided_slice %85 {offsets = [0, 0], sizes = [2, 32], strides = [1, 1]} : vector<2x512xf32> to vector<2x32xf32>
    %87 = arith.negf %86 : vector<2x32xf32>
    %88 = math.exp %87 : vector<2x32xf32>
    %cst_29 = arith.constant 1.000000e+00 : f32
    %89 = vector.broadcast %cst_29 : f32 to vector<2x32xf32>
    %90 = arith.addf %89, %88 : vector<2x32xf32>
    %91 = arith.divf %89, %90 : vector<2x32xf32>
    %92 = vector.extract_strided_slice %85 {offsets = [0, 128], sizes = [2, 32], strides = [1, 1]} : vector<2x512xf32> to vector<2x32xf32>
    %93 = arith.negf %92 : vector<2x32xf32>
    %94 = math.exp %93 : vector<2x32xf32>
    %cst_30 = arith.constant 1.000000e+00 : f32
    %95 = vector.broadcast %cst_30 : f32 to vector<2x32xf32>
    %96 = arith.addf %95, %94 : vector<2x32xf32>
    %97 = arith.divf %95, %96 : vector<2x32xf32>
    %98 = vector.extract_strided_slice %85 {offsets = [0, 256], sizes = [2, 32], strides = [1, 1]} : vector<2x512xf32> to vector<2x32xf32>
    %99 = math.tanh %98 : vector<2x32xf32>
    %100 = vector.extract_strided_slice %85 {offsets = [0, 384], sizes = [2, 32], strides = [1, 1]} : vector<2x512xf32> to vector<2x32xf32>
    %101 = arith.negf %100 : vector<2x32xf32>
    %102 = math.exp %101 : vector<2x32xf32>
    %cst_31 = arith.constant 1.000000e+00 : f32
    %103 = vector.broadcast %cst_31 : f32 to vector<2x32xf32>
    %104 = arith.addf %103, %102 : vector<2x32xf32>
    %105 = arith.divf %103, %104 : vector<2x32xf32>
    %106 = arith.mulf %97, %81 : vector<2x32xf32>
    %107 = arith.mulf %91, %99 : vector<2x32xf32>
    %108 = arith.addf %106, %107 : vector<2x32xf32>
    %109 = math.tanh %108 : vector<2x32xf32>
    %110 = arith.mulf %105, %109 : vector<2x32xf32>
    %cst_32 = arith.constant dense<0.000000e+00> : vector<2x512xf32>
    %111 = tpu.matmul %110, %27, %cst_32 {dimension_numbers = #tpu.dot_dimension_numbers<[1], [0], [0], [1], [0, 0, 1, 1], [], []>} : vector<2x32xf32>, vector<32x512xf32>, vector<2x512xf32> -> vector<2x512xf32>
    %112 = arith.addf %21, %111 : vector<2x512xf32>
    %113 = vector.extract_strided_slice %112 {offsets = [0, 0], sizes = [2, 32], strides = [1, 1]} : vector<2x512xf32> to vector<2x32xf32>
    %114 = arith.negf %113 : vector<2x32xf32>
    %115 = math.exp %114 : vector<2x32xf32>
    %cst_33 = arith.constant 1.000000e+00 : f32
    %116 = vector.broadcast %cst_33 : f32 to vector<2x32xf32>
    %117 = arith.addf %116, %115 : vector<2x32xf32>
    %118 = arith.divf %116, %117 : vector<2x32xf32>
    %119 = vector.extract_strided_slice %112 {offsets = [0, 128], sizes = [2, 32], strides = [1, 1]} : vector<2x512xf32> to vector<2x32xf32>
    %120 = arith.negf %119 : vector<2x32xf32>
    %121 = math.exp %120 : vector<2x32xf32>
    %cst_34 = arith.constant 1.000000e+00 : f32
    %122 = vector.broadcast %cst_34 : f32 to vector<2x32xf32>
    %123 = arith.addf %122, %121 : vector<2x32xf32>
    %124 = arith.divf %122, %123 : vector<2x32xf32>
    %125 = vector.extract_strided_slice %112 {offsets = [0, 256], sizes = [2, 32], strides = [1, 1]} : vector<2x512xf32> to vector<2x32xf32>
    %126 = math.tanh %125 : vector<2x32xf32>
    %127 = vector.extract_strided_slice %112 {offsets = [0, 384], sizes = [2, 32], strides = [1, 1]} : vector<2x512xf32> to vector<2x32xf32>
    %128 = arith.negf %127 : vector<2x32xf32>
    %129 = math.exp %128 : vector<2x32xf32>
    %cst_35 = arith.constant 1.000000e+00 : f32
    %130 = vector.broadcast %cst_35 : f32 to vector<2x32xf32>
    %131 = arith.addf %130, %129 : vector<2x32xf32>
    %132 = arith.divf %130, %131 : vector<2x32xf32>
    %133 = arith.mulf %124, %108 : vector<2x32xf32>
    %134 = arith.mulf %118, %126 : vector<2x32xf32>
    %135 = arith.addf %133, %134 : vector<2x32xf32>
    %136 = math.tanh %135 : vector<2x32xf32>
    %137 = arith.mulf %132, %136 : vector<2x32xf32>
    %cst_36 = arith.constant dense<0.000000e+00> : vector<2x512xf32>
    %138 = tpu.matmul %137, %27, %cst_36 {dimension_numbers = #tpu.dot_dimension_numbers<[1], [0], [0], [1], [0, 0, 1, 1], [], []>} : vector<2x32xf32>, vector<32x512xf32>, vector<2x512xf32> -> vector<2x512xf32>
    %139 = arith.addf %26, %138 : vector<2x512xf32>
    %140 = vector.extract_strided_slice %139 {offsets = [0, 0], sizes = [2, 32], strides = [1, 1]} : vector<2x512xf32> to vector<2x32xf32>
    %141 = arith.negf %140 : vector<2x32xf32>
    %142 = math.exp %141 : vector<2x32xf32>
    %cst_37 = arith.constant 1.000000e+00 : f32
    %143 = vector.broadcast %cst_37 : f32 to vector<2x32xf32>
    %144 = arith.addf %143, %142 : vector<2x32xf32>
    %145 = arith.divf %143, %144 : vector<2x32xf32>
    %146 = vector.extract_strided_slice %139 {offsets = [0, 128], sizes = [2, 32], strides = [1, 1]} : vector<2x512xf32> to vector<2x32xf32>
    %147 = arith.negf %146 : vector<2x32xf32>
    %148 = math.exp %147 : vector<2x32xf32>
    %cst_38 = arith.constant 1.000000e+00 : f32
    %149 = vector.broadcast %cst_38 : f32 to vector<2x32xf32>
    %150 = arith.addf %149, %148 : vector<2x32xf32>
    %151 = arith.divf %149, %150 : vector<2x32xf32>
    %152 = vector.extract_strided_slice %139 {offsets = [0, 256], sizes = [2, 32], strides = [1, 1]} : vector<2x512xf32> to vector<2x32xf32>
    %153 = math.tanh %152 : vector<2x32xf32>
    %154 = vector.extract_strided_slice %139 {offsets = [0, 384], sizes = [2, 32], strides = [1, 1]} : vector<2x512xf32> to vector<2x32xf32>
    %155 = arith.negf %154 : vector<2x32xf32>
    %156 = math.exp %155 : vector<2x32xf32>
    %cst_39 = arith.constant 1.000000e+00 : f32
    %157 = vector.broadcast %cst_39 : f32 to vector<2x32xf32>
    %158 = arith.addf %157, %156 : vector<2x32xf32>
    %159 = arith.divf %157, %158 : vector<2x32xf32>
    %160 = arith.mulf %151, %135 : vector<2x32xf32>
    %161 = arith.mulf %145, %153 : vector<2x32xf32>
    %162 = arith.addf %160, %161 : vector<2x32xf32>
    %163 = math.tanh %162 : vector<2x32xf32>
    %164 = arith.mulf %159, %163 : vector<2x32xf32>
    %c0_40 = arith.constant 0 : index
    %c0_41 = arith.constant 0 : index
    %c0_42 = arith.constant 0 : index
    %165 = vector.load %arg1[%c0_40, %c0_41, %c0_42] : memref<2x5x13xf32, #tpu.memory_space<vmem>>, vector<2x1x13xf32>
    %166 = vector.shape_cast %165 : vector<2x1x13xf32> to vector<2x13xf32>
    %c0_43 = arith.constant 0 : index
    %c0_44 = arith.constant 0 : index
    %167 = vector.load %arg3[%c0_43, %c0_44] : memref<136x128xf32, #tpu.memory_space<vmem>>, vector<13x32xf32>
    %c16_45 = arith.constant 16 : index
    %c0_46 = arith.constant 0 : index
    %168 = vector.load %arg3[%c16_45, %c0_46] : memref<136x128xf32, #tpu.memory_space<vmem>>, vector<32x32xf32>
    %c48_47 = arith.constant 48 : index
    %c0_48 = arith.constant 0 : index
    %169 = vector.load %arg3[%c48_47, %c0_48] : memref<136x128xf32, #tpu.memory_space<vmem>>, vector<1x32xf32>
    %cst_49 = arith.constant dense<0.000000e+00> : vector<2x32xf32>
    %170 = tpu.matmul %166, %167, %cst_49 {dimension_numbers = #tpu.dot_dimension_numbers<[1], [0], [0], [1], [0, 0, 1, 1], [], []>} : vector<2x13xf32>, vector<13x32xf32>, vector<2x32xf32> -> vector<2x32xf32>
    %cst_50 = arith.constant dense<0.000000e+00> : vector<2x32xf32>
    %171 = tpu.matmul %164, %168, %cst_50 {dimension_numbers = #tpu.dot_dimension_numbers<[1], [0], [0], [1], [0, 0, 1, 1], [], []>} : vector<2x32xf32>, vector<32x32xf32>, vector<2x32xf32> -> vector<2x32xf32>
    %172 = arith.addf %170, %171 : vector<2x32xf32>
    %173 = vector.broadcast %169 : vector<1x32xf32> to vector<2x32xf32>
    %174 = arith.addf %172, %173 : vector<2x32xf32>
    %cst_51 = arith.constant 0.000000e+00 : f32
    %175 = vector.broadcast %cst_51 : f32 to vector<2x32xf32>
    %176 = arith.maximumf %174, %175 : vector<2x32xf32>
    %c56 = arith.constant 56 : index
    %c0_52 = arith.constant 0 : index
    %177 = vector.load %arg3[%c56, %c0_52] : memref<136x128xf32, #tpu.memory_space<vmem>>, vector<32x32xf32>
    %c88 = arith.constant 88 : index
    %c0_53 = arith.constant 0 : index
    %178 = vector.load %arg3[%c88, %c0_53] : memref<136x128xf32, #tpu.memory_space<vmem>>, vector<1x32xf32>
    %cst_54 = arith.constant dense<0.000000e+00> : vector<2x32xf32>
    %179 = tpu.matmul %176, %177, %cst_54 {dimension_numbers = #tpu.dot_dimension_numbers<[1], [0], [0], [1], [0, 0, 1, 1], [], []>} : vector<2x32xf32>, vector<32x32xf32>, vector<2x32xf32> -> vector<2x32xf32>
    %180 = vector.broadcast %178 : vector<1x32xf32> to vector<2x32xf32>
    %181 = arith.addf %179, %180 : vector<2x32xf32>
    %cst_55 = arith.constant 0.000000e+00 : f32
    %182 = vector.broadcast %cst_55 : f32 to vector<2x32xf32>
    %183 = arith.maximumf %181, %182 : vector<2x32xf32>
    %c96 = arith.constant 96 : index
    %c0_56 = arith.constant 0 : index
    %184 = vector.load %arg3[%c96, %c0_56] : memref<136x128xf32, #tpu.memory_space<vmem>>, vector<32x4xf32>
    %c128 = arith.constant 128 : index
    %c0_57 = arith.constant 0 : index
    %185 = vector.load %arg3[%c128, %c0_57] : memref<136x128xf32, #tpu.memory_space<vmem>>, vector<1x4xf32>
    %cst_58 = arith.constant dense<0.000000e+00> : vector<2x4xf32>
    %186 = tpu.matmul %183, %184, %cst_58 {dimension_numbers = #tpu.dot_dimension_numbers<[1], [0], [0], [1], [0, 0, 1, 1], [], []>} : vector<2x32xf32>, vector<32x4xf32>, vector<2x4xf32> -> vector<2x4xf32>
    %187 = vector.broadcast %185 : vector<1x4xf32> to vector<2x4xf32>
    %188 = arith.addf %186, %187 : vector<2x4xf32>
    %189 = tpu.iota {dimensions = array<i32: 1>} : vector<2x4xi32>
    %c2_i32 = arith.constant 2 : i32
    %190 = vector.broadcast %c2_i32 : i32 to vector<2x4xi32>
    %191 = arith.cmpi sge, %189, %190 : vector<2x4xi32>
    %cst_59 = arith.constant -2.000000e+01 : f32
    %cst_60 = arith.constant 2.000000e+00 : f32
    %192 = vector.broadcast %cst_59 : f32 to vector<2x4xf32>
    %193 = arith.maximumf %192, %188 : vector<2x4xf32>
    %194 = vector.broadcast %cst_60 : f32 to vector<2x4xf32>
    %195 = arith.minimumf %194, %193 : vector<2x4xf32>
    %196 = arith.select %191, %195, %188 : vector<2x4xi1>, vector<2x4xf32>
    %c0_61 = arith.constant 0 : index
    %c0_62 = arith.constant 0 : index
    %197 = vector.load %arg4[%c0_61, %c0_62] : memref<2x4xf32, #tpu.memory_space<vmem>>, vector<2x4xf32>
    tpu.vector_store %arg4[%c0_61, %c0_62], %196 {strides = array<i32>} : memref<2x4xf32, #tpu.memory_space<vmem>>, vector<2x4xf32>,
    return
  }
  func.func @transform_0(%arg0: i32) -> (i32, i32, i32) {
    %c0_i32 = arith.constant 0 : i32
    %c0_i32_0 = arith.constant 0 : i32
    %c0_i32_1 = arith.constant 0 : i32
    return %arg0, %c0_i32, %c0_i32_0 : i32, i32, i32
  }
  func.func @transform_1(%arg0: i32) -> (i32, i32) {
    %c0_i32 = arith.constant 0 : i32
    %c0_i32_0 = arith.constant 0 : i32
    %c0_i32_1 = arith.constant 0 : i32
    return %c0_i32, %c0_i32_0 : i32, i32
  }
  func.func @transform_2(%arg0: i32) -> (i32, i32) {
    %c0_i32 = arith.constant 0 : i32
    %c0_i32_0 = arith.constant 0 : i32
    %c0_i32_1 = arith.constant 0 : i32
    return %c0_i32, %c0_i32_0 : i32, i32
  }
  func.func @transform_3(%arg0: i32) -> (i32, i32) {
    %c0_i32 = arith.constant 0 : i32
    %c0_i32_0 = arith.constant 0 : i32
    return %arg0, %c0_i32 : i32, i32
  }
}

</mosaic_0001>

<bundles_post_ra>
// kernel: policy_forward.1
= control target key start
LH: loop header
LB: loop body
LE: loop exit
PB: predicated region body
PF: predicated region fallthrough
CT: control target
= control target key end

     0   :  { %8 = vsyncpa [#allocation3], 0  ;;  %s2005_s0 = inlined_call_operand.vmem [shape: f32[2,5,13], index: 0, kind: input, shape index: {}]   ;;  %s2006_s1 = inlined_call_operand.hbm [shape: f32[56,512], index: 1, kind: input, shape index: {}]   ;;  %s2007_s2 = inlined_call_operand.hbm [shape: f32[136,128], index: 2, kind: input, shape index: {}]   ;;  %s2008_s3 = inlined_call_operand.vmem [shape: f32[2,4], index: 3, kind: output, shape index: {}]  }
   0x1   :  { %s16_s14 = sshll.u32 %s2006_s1, 4  ;;  %s17_s14 = int_to_ptr.hbm [resolvable:$true] %s16_s14 }
   0x2   :  { %9 = vsyncpa [#allocation5], 0  ;;  %s1634_s15 = smov [#allocation2]   ;;  %s29_s19 = sshll.u32 %s2007_s2, 4  ;;  %s30_s19 = int_to_ptr.hbm [resolvable:$true] %s29_s19 }
   0x3   :  { %s18_s16 = sshll.u32 %s1634_s15, 4  ;;  %s1635_s20 = smov 512   ;;  %s19_s16 = int_to_ptr.vmem [resolvable:$true] %s18_s16 }
   0x4   :  { %s1636_s21 = smov 32   ;;  %s1637_s22 = smov [#allocation4]  }
   0x5   :  { %24 = dma.hbm_to_vmem [thread:$0]  %s17_s14, 3584, %s19_s16, [#allocation3], %s1635_s20, %s1635_s20, %s1636_s21  }
   0x6   :  { %s31_s23 = sshll.u32 %s1637_s22, 4  ;;  %s1638_s24 = smov 128   ;;  %s32_s23 = int_to_ptr.vmem [resolvable:$true] %s31_s23 }
   0x7   :  { %s1639_s25 = smov 8  }
   0x8   :  { %37 = dma.hbm_to_vmem [thread:$0]  %s30_s19, 2176, %s32_s23, [#allocation5], %s1638_s24, %s1638_s24, %s1639_s25  }
   0x9   :  { %1630 = dma.done.wait [#allocation3], 3584  }
   0xa   :  { %1631 = vsyncadd [#allocation3], 4294963712 }
   0xb   :  { %1632 = dma.done.wait [#allocation5], 2176  }
   0xc   :  { %1633 = vsyncadd [#allocation5], 4294965120  ;;  %vm75_vm0 = vcmask 1044480   ;;  %v1667_v0 = vld [vmem:[#allocation2 + $0x20] sm:$0x1f]  ;;  %v1681_v5 = vld [vmem:[#allocation2 + $0x8] sm:$0xff] }
   0xd   :  { %v1669_v1 = vld [vmem:[#allocation2 + $0x28] sm:$0x1f]  ;;  %v1671_v2 = vld [vmem:[#allocation2 + $0x30] sm:$0x1f]  ;;  %1416 = vmatpush.msk.msra.mxu0 %vm75_vm0, %v1667_v0  ;;  %v1677_v3 = vld [vmem:[#allocation2 + $0x38] sm:$0x1f] }
   0xe   :  { %1418 = vmatpush.msk.msra.mxu1 %vm75_vm0, %v1669_v1  ;;  %v1679_v4 = vld [vmem:[#allocation2] sm:$0xff]  ;;  %1420 = vmatpush.msk.msra.mxu2 %vm75_vm0, %v1671_v2  ;;  %v1687_v6 = vld [vmem:[#allocation2 + $0x10] sm:$0xff]  ;;  %v1689_v7 = vld [vmem:[#allocation2 + $0x18] sm:$0xff]  ;;  %vm70_vm1 = vcmask 1041409   ;;  %vm72_vm2 = vcmask 105472   ;;  %v1640_v44 = vmov 0.0  }
   0xf   :  { %1422 = vmatpush.msk.msra.mxu3 %vm75_vm0, %v1677_v3  ;;  %103 = vmatpush.msra.mxu0 %v1679_v4  ;;  %v56_v8 = vld [vmem:[%s2005_s0] sm:$0x1]  ;;  %v57_v9 = vld [vmem:[%s2005_s0 + $0x8] sm:$0x1]  ;;  %v169_v11 = vld [vmem:[%s2005_s0 + $0x9] sm:$0x1] }
  0x10   :  { %123 = vmatpush.msra.mxu1 %v1681_v5  ;;  %143 = vmatpush.msra.mxu2 %v1687_v6  ;;  %v69_v10 = vrot.slane %v57_v9, 7  ;;  %v172_v13 = vrot.slane %v169_v11, 7  ;;  %v168_v14 = vld [vmem:[%s2005_s0 + $0x1] sm:$0x1]  ;;  %v257_v16 = vld [vmem:[%s2005_s0 + $0xa] sm:$0x1] }
  0x11   :  { %163 = vmatpush.msra.mxu3 %v1689_v7  ;;  %1424 = vmatpush.msk.msrb.mxu0 %vm75_vm0, %v1667_v0  ;;  %v260_v17 = vrot.slane %v257_v16, 7  ;;  %v256_v18 = vld [vmem:[%s2005_s0 + $0x2] sm:$0x1]  ;;  %v345_v20 = vld [vmem:[%s2005_s0 + $0xb] sm:$0x1]  ;;  %v1798_v27 = vld [vmem:[#allocation2 + $0xb0] sm:$0xff] }
  0x12   :  { %1426 = vmatpush.msk.msrb.mxu1 %vm75_vm0, %v1669_v1  ;;  %v1709_v12 = vsel %vm70_vm1, %v69_v10, %v56_v8  ;;  %1428 = vmatpush.msk.msrb.mxu2 %vm75_vm0, %v1671_v2  ;;  %v173_v15 = vsel %vm70_vm1, %v172_v13, %v168_v14  ;;  %v348_v21 = vrot.slane %v345_v20, 7  ;;  %v344_v22 = vld [vmem:[%s2005_s0 + $0x3] sm:$0x1]  ;;  %v433_v24 = vld [vmem:[%s2005_s0 + $0xc] sm:$0x1]  ;;  %v1800_v28 = vld [vmem:[#allocation2 + $0xb8] sm:$0xff] }
  0x13   :  { %1430 = vmatpush.msk.msrb.mxu3 %vm75_vm0, %v1677_v3  ;;  %1417 = vmatmul.msk.f32.vlgmr.msra.gmra.mxu0 %vm72_vm2, %v1709_v12  ;;  %v261_v19 = vsel %vm70_vm1, %v260_v17, %v256_v18  ;;  %v1792_v25 = vld [vmem:[#allocation2 + $0xa0] sm:$0xff]  ;;  %v1794_v26 = vld [vmem:[#allocation2 + $0xa8] sm:$0xff]  ;;  %v436_v29 = vrot.slane %v433_v24, 7  ;;  %v1813_v33 = vld [vmem:[#allocation2 + $0x90] sm:$0xff]  ;;  %vm536_vm15 = vcmask 261120  }
  0x14   :  { %1419 = vmatmul.msk.f32.vlgmr.msra.gmra.mxu1 %vm72_vm2, %v1709_v12  ;;  %1421 = vmatmul.msk.f32.vlgmr.msra.gmra.mxu2 %vm72_vm2, %v1709_v12  ;;  %v349_v23 = vsel %vm70_vm1, %v348_v21, %v344_v22  ;;  %v1804_v30 = vld [vmem:[#allocation2 + $0x80] sm:$0xff]  ;;  %v1806_v31 = vld [vmem:[#allocation2 + $0x88] sm:$0xff]  ;;  %v1815_v34 = vld [vmem:[#allocation2 + $0x98] sm:$0xff] }
  0x15   :  { %1423 = vmatmul.msk.f32.vlgmr.msra.gmra.mxu3 %vm72_vm2, %v1709_v12  ;;  %191 = vmatpush.msrb.mxu0 %v1679_v4  ;;  %v432_v32 = vld [vmem:[%s2005_s0 + $0x4] sm:$0x1]  ;;  %v1821_v36 = vld [vmem:[#allocation2 + $0x68] sm:$0xff]  ;;  %v1825_v37 = vld [vmem:[#allocation2 + $0x70] sm:$0xff] }
  0x16   :  { %211 = vmatpush.msrb.mxu1 %v1681_v5  ;;  %231 = vmatpush.msrb.mxu2 %v1687_v6  ;;  %v1819_v35 = vld [vmem:[#allocation2 + $0x60] sm:$0xff]  ;;  %v1827_v38 = vld [vmem:[#allocation2 + $0x78] sm:$0xff]  ;;  %v437_v39 = vsel %vm70_vm1, %v436_v29, %v432_v32  ;;  %v1838_v41 = vld [vmem:[#allocation2 + $0x48] sm:$0xff] }
  0x17   :  { %251 = vmatpush.msrb.mxu3 %v1689_v7  ;;  %1432 = vmatpush.msk.msra.mxu0 %vm75_vm0, %v1667_v0  ;;  %v1836_v40 = vld [vmem:[#allocation2 + $0x40] sm:$0xff]  ;;  %v1842_v42 = vld [vmem:[#allocation2 + $0x50] sm:$0xff]  ;;  %v1844_v43 = vld [vmem:[#allocation2 + $0x58] sm:$0xff] }
  0x18   :  { %1434 = vmatpush.msk.msra.mxu1 %vm75_vm0, %v1669_v1  ;;  %1436 = vmatpush.msk.msra.mxu2 %vm75_vm0, %v1671_v2  ;;  %v55_v47 = vld [vmem:[#allocation2 + $0xc0] ss:$8 sm:$0xf] }
  0x19   :  { %1438 = vmatpush.msk.msra.mxu3 %vm75_vm0, %v1677_v3  ;;  %279 = vmatpush.msra.mxu0 %v1679_v4  ;;  %v59_v48 = vperm.slane %v55_v47, 0  ;;  %v60_v49 = vperm.slane %v55_v47, 1  ;;  %v61_v56 = vperm.slane %v55_v47, 2  ;;  %v62_v57 = vperm.slane %v55_v47, 3 }
  0x1a   :  { %299 = vmatpush.msra.mxu1 %v1681_v5  ;;  %319 = vmatpush.msra.mxu2 %v1687_v6 }
  0x1b   :  { %339 = vmatpush.msra.mxu3 %v1689_v7  ;;  %1425 = vmatmul.msk.f32.vlgmr.msrb.gmra.mxu0 %vm72_vm2, %v173_v15 }
  0x1c   :  { %1427 = vmatmul.msk.f32.vlgmr.msrb.gmra.mxu1 %vm72_vm2, %v173_v15  ;;  %1429 = vmatmul.msk.f32.vlgmr.msrb.gmra.mxu2 %vm72_vm2, %v173_v15 }
  0x1d   :  { %1431 = vmatmul.msk.f32.vlgmr.msrb.gmra.mxu3 %vm72_vm2, %v173_v15  ;;  %1440 = vmatpush.msk.msrb.mxu0 %vm75_vm0, %v1667_v0 }
  0x1e   :  { %1442 = vmatpush.msk.msrb.mxu1 %vm75_vm0, %v1669_v1  ;;  %1444 = vmatpush.msk.msrb.mxu2 %vm75_vm0, %v1671_v2 }
  0x1f   :  { %1446 = vmatpush.msk.msrb.mxu3 %vm75_vm0, %v1677_v3  ;;  %367 = vmatpush.msrb.mxu0 %v1679_v4 }
  0x20   :  { %387 = vmatpush.msrb.mxu1 %v1681_v5  ;;  %407 = vmatpush.msrb.mxu2 %v1687_v6 }
  0x21   :  { %427 = vmatpush.msrb.mxu3 %v1689_v7 }
  0x23   :  { %1433 = vmatmul.msk.f32.vlgmr.msra.gmra.mxu0 %vm72_vm2, %v261_v19 }
  0x24   :  { %1435 = vmatmul.msk.f32.vlgmr.msra.gmra.mxu1 %vm72_vm2, %v261_v19  ;;  %1437 = vmatmul.msk.f32.vlgmr.msra.gmra.mxu2 %vm72_vm2, %v261_v19 }
  0x25   :  { %1439 = vmatmul.msk.f32.vlgmr.msra.gmra.mxu3 %vm72_vm2, %v261_v19  ;;  %1448 = vmatpush.msk.msra.mxu0 %vm75_vm0, %v1667_v0 }
  0x26   :  { %1450 = vmatpush.msk.msra.mxu1 %vm75_vm0, %v1669_v1  ;;  %1452 = vmatpush.msk.msra.mxu2 %vm75_vm0, %v1671_v2 }
  0x27   :  { %1454 = vmatpush.msk.msra.mxu3 %vm75_vm0, %v1677_v3  ;;  %455 = vmatpush.msra.mxu0 %v1679_v4 }
  0x28   :  { %475 = vmatpush.msra.mxu1 %v1681_v5  ;;  %495 = vmatpush.msra.mxu2 %v1687_v6 }
  0x29   :  { %515 = vmatpush.msra.mxu3 %v1689_v7 }
  0x2b   :  { %1441 = vmatmul.msk.f32.vlgmr.msrb.gmra.mxu0 %vm72_vm2, %v349_v23 }
  0x2c   :  { %1443 = vmatmul.msk.f32.vlgmr.msrb.gmra.mxu1 %vm72_vm2, %v349_v23  ;;  %1445 = vmatmul.msk.f32.vlgmr.msrb.gmra.mxu2 %vm72_vm2, %v349_v23 }
  0x2d   :  { %1447 = vmatmul.msk.f32.vlgmr.msrb.gmra.mxu3 %vm72_vm2, %v349_v23  ;;  %552 = vmatpush.msrb.mxu0 %v1792_v25 }
  0x2e   :  { %572 = vmatpush.msrb.mxu1 %v1794_v26  ;;  %592 = vmatpush.msrb.mxu2 %v1798_v27 }
  0x2f   :  { %612 = vmatpush.msrb.mxu3 %v1800_v28  ;;  %553 = vmatpush.msrb.mxu0 %v1804_v30 }
  0x30   :  { %573 = vmatpush.msrb.mxu1 %v1806_v31  ;;  %593 = vmatpush.msrb.mxu2 %v1813_v33 }
  0x31   :  { %613 = vmatpush.msrb.mxu3 %v1815_v34  ;;  %554 = vmatpush.msrb.mxu0 %v1819_v35 }
  0x32   :  { %574 = vmatpush.msrb.mxu1 %v1821_v36  ;;  %594 = vmatpush.msrb.mxu2 %v1825_v37 }
  0x33   :  { %614 = vmatpush.msrb.mxu3 %v1827_v38  ;;  %1449 = vmatmul.msk.f32.vlgmr.msra.gmra.mxu0 %vm72_vm2, %v437_v39 }
  0x34   :  { %1451 = vmatmul.msk.f32.vlgmr.msra.gmra.mxu1 %vm72_vm2, %v437_v39  ;;  %1453 = vmatmul.msk.f32.vlgmr.msra.gmra.mxu2 %vm72_vm2, %v437_v39 }
  0x35   :  { %1455 = vmatmul.msk.f32.vlgmr.msra.gmra.mxu3 %vm72_vm2, %v437_v39  ;;  %555 = vmatpush.msrb.mxu0 %v1836_v40 }
  0x36   :  { %575 = vmatpush.msrb.mxu1 %v1838_v41  ;;  %595 = vmatpush.msrb.mxu2 %v1842_v42 }
  0x37   :  { %615 = vmatpush.msrb.mxu3 %v1844_v43  ;;  %702 = vmatpush.msra.mxu0 %v1792_v25 }
  0x38   :  { %722 = vmatpush.msra.mxu1 %v1794_v26  ;;  %742 = vmatpush.msra.mxu2 %v1798_v27 }
  0x39   :  { %762 = vmatpush.msra.mxu3 %v1800_v28  ;;  %703 = vmatpush.msra.mxu0 %v1804_v30 }
  0x3a   :  { %723 = vmatpush.msra.mxu1 %v1806_v31  ;;  %743 = vmatpush.msra.mxu2 %v1813_v33 }
  0x3b   :  { %763 = vmatpush.msra.mxu3 %v1815_v34  ;;  %556 = vmatmul.f32.vlgmr.msrb.gmra.mxu0 %v1640_v44 }
  0x3c   :  { %576 = vmatmul.f32.vlgmr.msrb.gmra.mxu1 %v1640_v44  ;;  %596 = vmatmul.f32.vlgmr.msrb.gmra.mxu2 %v1640_v44 }
  0x3d   :  { %616 = vmatmul.f32.vlgmr.msrb.gmra.mxu3 %v1640_v44  ;;  %704 = vmatpush.msra.mxu0 %v1819_v35 }
  0x3e   :  { %724 = vmatpush.msra.mxu1 %v1821_v36  ;;  %744 = vmatpush.msra.mxu2 %v1825_v37 }
  0x3f   :  { %764 = vmatpush.msra.mxu3 %v1827_v38  ;;  %705 = vmatpush.msra.mxu0 %v1836_v40 }
  0x40   :  { %725 = vmatpush.msra.mxu1 %v1838_v41  ;;  %745 = vmatpush.msra.mxu2 %v1842_v42 }
  0x41   :  { %765 = vmatpush.msra.mxu3 %v1844_v43  ;;  %852 = vmatpush.msrb.mxu0 %v1792_v25 }
  0x42   :  { %872 = vmatpush.msrb.mxu1 %v1794_v26  ;;  %892 = vmatpush.msrb.mxu2 %v1798_v27 }
  0x43   :  { %912 = vmatpush.msrb.mxu3 %v1800_v28  ;;  %853 = vmatpush.msrb.mxu0 %v1804_v30 }
  0x44   :  { %873 = vmatpush.msrb.mxu1 %v1806_v31  ;;  %893 = vmatpush.msrb.mxu2 %v1813_v33 }
  0x45   :  { %913 = vmatpush.msrb.mxu3 %v1815_v34  ;;  %854 = vmatpush.msrb.mxu0 %v1819_v35 }
  0x46   :  { %874 = vmatpush.msrb.mxu1 %v1821_v36  ;;  %894 = vmatpush.msrb.mxu2 %v1825_v37 }
  0x47   :  { %914 = vmatpush.msrb.mxu3 %v1827_v38  ;;  %855 = vmatpush.msrb.mxu0 %v1836_v40 }
  0x48   :  { %875 = vmatpush.msrb.mxu1 %v1838_v41  ;;  %895 = vmatpush.msrb.mxu2 %v1842_v42 }
  0x49   :  { %915 = vmatpush.msrb.mxu3 %v1844_v43 }
  0x90   :  { %v105_v45 = vpop.f32.mrf.mxu0 }
  0x91   :  { %v125_v46 = vpop.f32.mrf.mxu1  ;;  %v106_v19 = vadd.f32 %v105_v45, %v59_v48 }
  0x92   :  { %v126_v20 = vadd.f32 %v125_v46, %v60_v49 }
  0x97   :  { %v145_v50 = vpop.f32.mrf.mxu2 }
  0x98   :  { %v165_v51 = vpop.f32.mrf.mxu3  ;;  %v193_v52 = vpop.f32.mrf.mxu0 }
  0x99   :  { %v213_v53 = vpop.f32.mrf.mxu1  ;;  %v1884_v54 = vadd.f32 %v193_v52, %v59_v48 }
  0x9a   :  { %v1886_v55 = vadd.f32 %v213_v53, %v60_v49  ;;  %v166_v53 = vadd.f32 %v165_v51, %v62_v57 }
  0x9f   :  { %v233_v58 = vpop.f32.mrf.mxu2 }
  0xa0   :  { %v253_v59 = vpop.f32.mrf.mxu3  ;;  %v1888_v60 = vadd.f32 %v233_v58, %v61_v56  ;;  %v281_v62 = vpop.f32.mrf.mxu0 }
  0xa1   :  { %v1890_v61 = vadd.f32 %v253_v59, %v62_v57  ;;  %v301_v63 = vpop.f32.mrf.mxu1  ;;  %v1892_v0 = vadd.f32 %v281_v62, %v59_v48 }
  0xa2   :  { %v1894_v1 = vadd.f32 %v301_v63, %v60_v49 }
  0xa7   :  { %v321_v2 = vpop.f32.mrf.mxu2 }
  0xa8   :  { %v341_v3 = vpop.f32.mrf.mxu3  ;;  %v1896_v4 = vadd.f32 %v321_v2, %v61_v56  ;;  %v369_v6 = vpop.f32.mrf.mxu0 }
  0xa9   :  { %v1898_v5 = vadd.f32 %v341_v3, %v62_v57  ;;  %v389_v7 = vpop.f32.mrf.mxu1  ;;  %v1900_v8 = vadd.f32 %v369_v6, %v59_v48  ;;  %v146_v3 = vadd.f32 %v145_v50, %v61_v56 }
  0xaa   :  { %v1902_v9 = vadd.f32 %v389_v7, %v60_v49 }
  0xaf   :  { %v409_v10 = vpop.f32.mrf.mxu2 }
  0xb0   :  { %v429_v11 = vpop.f32.mrf.mxu3  ;;  %v1904_v13 = vadd.f32 %v409_v10, %v61_v56  ;;  %v457_v15 = vpop.f32.mrf.mxu0 }
  0xb1   :  { %v1906_v14 = vadd.f32 %v429_v11, %v62_v57  ;;  %v477_v16 = vpop.f32.mrf.mxu1  ;;  %v1908_v17 = vadd.f32 %v457_v15, %v59_v48 }
  0xb2   :  { %v1910_v18 = vadd.f32 %v477_v16, %v60_v49 }
  0xb7   :  { %v497_v21 = vpop.f32.mrf.mxu2 }
  0xb8   :  { %v517_v22 = vpop.f32.mrf.mxu3  ;;  %v1912_v23 = vadd.f32 %v497_v21, %v61_v56  ;;  %v557_v29 = vpop.f32.mrf.mxu0 }
  0xb9   :  { %v1914_v24 = vadd.f32 %v517_v22, %v62_v57  ;;  %v577_v32 = vpop.f32.mrf.mxu1  ;;  %v620_v39 = vadd.f32 %v557_v29, %v106_v19 }
  0xba   :  { %v621_v44 = vadd.f32 %v577_v32, %v126_v20 }
  0xbb   :  { %v1456_v47 = vmul.f32 -1.442695, %v620_v39 }
  0xbc   :  { %v1457_v52 = vmul.f32 -1.442695, %v621_v44 }
  0xbd   :  { %1502 = vpow2.f32 %v1456_v47 }
  0xbe   :  { %1504 = vpow2.f32 %v1457_v52 }
  0xbf   :  { %v597_v63 = vpop.f32.mrf.mxu2 }
  0xc0   :  { %v617_v58 = vpop.f32.mrf.mxu3  ;;  %v622_v10 = vadd.f32 %v597_v63, %v146_v3 }
  0xc1   :  { %v623_v59 = vadd.f32 %v617_v58, %v166_v53 }
  0xc3   :  { %v1458_v62 = vmul.f32 -1.442695, %v623_v59  ;;  %v1503_v45 = vpop.eup %1502 }
  0xc4   :  { %v1505_v46 = vpop.eup %1504  ;;  %v627_v48 = vadd.f32 1.0, %v1503_v45 }
  0xc5   :  { %1506 = vpow2.f32 %v1458_v62  ;;  %v646_v49 = vadd.f32 1.0, %v1505_v46 }
  0xc6   :  { %1508 = vrcp.f32 %v627_v48  ;;  %v639_v19 = vand.u32 2147483648, %v627_v48  ;;  %v637_v22 = vand.u32 2147483647, %v627_v48  ;;  %vm633_vm5 = vweird.f32 %v627_v48 }
  0xc7   :  { %1510 = vrcp.f32 %v646_v49  ;;  %v658_v20 = vand.u32 2147483648, %v646_v49  ;;  %v656_v32 = vand.u32 2147483647, %v646_v49  ;;  %vm652_vm6 = vweird.f32 %v646_v49 }
  0xc8   :  { %v640_v56 = vor.u32 1.1754944e-38, %v639_v19  ;;  %vm638_vm8 = vcmp.eq.f32.partialorder %v637_v22, 8.507059e+37 }
  0xc9   :  { %v659_v52 = vor.u32 1.1754944e-38, %v658_v20  ;;  %vm657_vm10 = vcmp.eq.f32.partialorder %v656_v32, 8.507059e+37 }
  0xcb   :  { %v1507_v2 = vpop.eup %1506 }
  0xcc   :  { %v666_v6 = vadd.f32 1.0, %v1507_v2  ;;  %v1509_v7 = vpop.eup %1508 }
  0xcd   :  { %v1511_v11 = vpop.eup %1510  ;;  %v629_v15 = vmul.f32 %v1509_v7, %v627_v48  ;;  %vm634_vm3 = vweird.f32 %v1509_v7 }
  0xce   :  { %1512 = vrcp.f32 %v666_v6  ;;  %v648_v51 = vmul.f32 %v1511_v11, %v646_v49  ;;  %vm653_vm4 = vweird.f32 %v1511_v11  ;;  %vm635_vm7 = vmor %vm633_vm5, %vm634_vm3  ;;  %v678_v49 = vand.u32 2147483648, %v666_v6 }
  0xcf   :  { %v630_v57 = vsub.f32 1.0, %v629_v15  ;;  %1514 = vtanh.f32 %v622_v10  ;;  %vm654_vm9 = vmor %vm652_vm6, %vm653_vm4  ;;  %vm672_vm12 = vweird.f32 %v666_v6 }
  0xd0   :  { %v649_v16 = vsub.f32 1.0, %v648_v51  ;;  %v679_v51 = vor.u32 1.1754944e-38, %v678_v49 }
  0xd1   :  { %v631_v21 = vmul.f32 %v1509_v7, %v630_v57 }
  0xd2   :  { %v650_v29 = vmul.f32 %v1511_v11, %v649_v16 }
  0xd3   :  { %v632_v50 = vadd.f32 %v1509_v7, %v631_v21 }
  0xd4   :  { %v1513_v39 = vpop.eup %1512  ;;  %v651_v44 = vadd.f32 %v1511_v11, %v650_v29 }
  0xd5   :  { %v668_v47 = vmul.f32 %v1513_v39, %v666_v6  ;;  %v636_v53 = vsel %vm635_vm7, %v1509_v7, %v632_v50  ;;  %v1515_v58 = vpop.eup %1514  ;;  %vm673_vm11 = vweird.f32 %v1513_v39  ;;  %v676_v7 = vand.u32 2147483647, %v666_v6 }
  0xd6   :  { %v641_v59 = vsel %vm638_vm8, %v640_v56, %v636_v53  ;;  %v655_v62 = vsel %vm654_vm9, %v1511_v11, %v651_v44  ;;  %vm674_vm13 = vmor %vm672_vm12, %vm673_vm11 }
  0xd7   :  { %v669_v45 = vsub.f32 1.0, %v668_v47  ;;  %v660_v46 = vsel %vm657_vm10, %v659_v52, %v655_v62  ;;  %v683_v63 = vmul.f32 %v1515_v58, %v641_v59  ;;  %vm677_vm14 = vcmp.eq.f32.partialorder %v676_v7, 8.507059e+37 }
  0xd8   :  { %v682_v2 = vmul.f32 0.0, %v660_v46 }
  0xd9   :  { %v670_v3 = vmul.f32 %v1513_v39, %v669_v45 }
  0xda   :  { %v1916_v10 = vadd.f32 %v683_v63, %v682_v2 }
  0xdb   :  { %v671_v48 = vadd.f32 %v1513_v39, %v670_v3 }
  0xdc   :  { %1516 = vtanh.f32 %v1916_v10 }
  0xdd   :  { %v675_v15 = vsel %vm674_vm13, %v1513_v39, %v671_v48 }
  0xde   :  { %v680_v57 = vsel %vm677_vm14, %v679_v51, %v675_v15 }
  0xe2   :  { %v1517_v11 = vpop.eup %1516 }
  0xe3   :  { %v686_v16 = vmul.f32 %v1517_v11, %v680_v57 }
  0xe5   :  { %1459 = vmatmul.msk.f32.vlgmr.msra.gmra.mxu0 %vm536_vm15, %v686_v16  ;;  %1460 = vmatmul.msk.f32.vlgmr.msra.gmra.mxu1 %vm536_vm15, %v686_v16 }
  0xe6   :  { %1461 = vmatmul.msk.f32.vlgmr.msra.gmra.mxu2 %vm536_vm15, %v686_v16  ;;  %1462 = vmatmul.msk.f32.vlgmr.msra.gmra.mxu3 %vm536_vm15, %v686_v16 }
  0xe7   :  { %1002 = vmatpush.msra.mxu0 %v1792_v25  ;;  %1022 = vmatpush.msra.mxu1 %v1794_v26 }
  0xe8   :  { %1042 = vmatpush.msra.mxu2 %v1798_v27  ;;  %1062 = vmatpush.msra.mxu3 %v1800_v28 }
  0xe9   :  { %1003 = vmatpush.msra.mxu0 %v1804_v30  ;;  %1023 = vmatpush.msra.mxu1 %v1806_v31 }
  0xea   :  { %1043 = vmatpush.msra.mxu2 %v1813_v33  ;;  %1063 = vmatpush.msra.mxu3 %v1815_v34 }
  0xeb   :  { %1004 = vmatpush.msra.mxu0 %v1819_v35  ;;  %1024 = vmatpush.msra.mxu1 %v1821_v36 }
  0xec   :  { %1044 = vmatpush.msra.mxu2 %v1825_v37  ;;  %1064 = vmatpush.msra.mxu3 %v1827_v38 }
  0xed   :  { %1005 = vmatpush.msra.mxu0 %v1836_v40  ;;  %1025 = vmatpush.msra.mxu1 %v1838_v41 }
  0xee   :  { %1045 = vmatpush.msra.mxu2 %v1842_v42  ;;  %1065 = vmatpush.msra.mxu3 %v1844_v43 }
 0x162   :  { %v707_v6 = vpop.f32.mrf.mxu0  ;;  %v727_v19 = vpop.f32.mrf.mxu1 }
 0x163   :  { %v770_v20 = vadd.f32 %v707_v6, %v1884_v54  ;;  %v771_v21 = vadd.f32 %v727_v19, %v1886_v55 }
 0x165   :  { %v1463_v22 = vmul.f32 -1.442695, %v770_v20  ;;  %v1464_v29 = vmul.f32 -1.442695, %v771_v21 }
 0x167   :  { %1518 = vpow2.f32 %v1463_v22 }
 0x168   :  { %1520 = vpow2.f32 %v1464_v29 }
 0x169   :  { %v767_v32 = vpop.f32.mrf.mxu3  ;;  %v747_v53 = vpop.f32.mrf.mxu2 }
 0x16a   :  { %v773_v39 = vadd.f32 %v767_v32, %v1890_v61  ;;  %v772_v55 = vadd.f32 %v747_v53, %v1888_v60 }
 0x16c   :  { %v1465_v50 = vmul.f32 -1.442695, %v773_v39 }
 0x16d   :  { %v1519_v56 = vpop.eup %1518 }
 0x16e   :  { %v1521_v44 = vpop.eup %1520  ;;  %v777_v47 = vadd.f32 1.0, %v1519_v56  ;;  %1522 = vpow2.f32 %v1465_v50 }
 0x16f   :  { %v796_v52 = vadd.f32 1.0, %v1521_v44 }
 0x170   :  { %1524 = vrcp.f32 %v777_v47  ;;  %v789_v2 = vand.u32 2147483648, %v777_v47  ;;  %v787_v49 = vand.u32 2147483647, %v777_v47  ;;  %vm783_vm4 = vweird.f32 %v777_v47 }
 0x171   :  { %1526 = vrcp.f32 %v796_v52  ;;  %v808_v3 = vand.u32 2147483648, %v796_v52  ;;  %v806_v15 = vand.u32 2147483647, %v796_v52  ;;  %vm802_vm5 = vweird.f32 %v796_v52 }
 0x172   :  { %v790_v60 = vor.u32 1.1754944e-38, %v789_v2  ;;  %vm788_vm8 = vcmp.eq.f32.partialorder %v787_v49, 8.507059e+37 }
 0x173   :  { %v809_v6 = vor.u32 1.1754944e-38, %v808_v3  ;;  %vm807_vm9 = vcmp.eq.f32.partialorder %v806_v15, 8.507059e+37 }
 0x174   :  { %v1523_v58 = vpop.eup %1522 }
 0x175   :  { %v816_v54 = vadd.f32 1.0, %v1523_v58 }
 0x176   :  { %v1525_v59 = vpop.eup %1524 }
 0x177   :  { %v1527_v62 = vpop.eup %1526  ;;  %v779_v45 = vmul.f32 %v1525_v59, %v777_v47  ;;  %1528 = vrcp.f32 %v816_v54  ;;  %vm784_vm1 = vweird.f32 %v1525_v59  ;;  %vm822_vm11 = vweird.f32 %v816_v54 }
 0x178   :  { %v798_v46 = vmul.f32 %v1527_v62, %v796_v52  ;;  %1530 = vtanh.f32 %v772_v55  ;;  %vm803_vm3 = vweird.f32 %v1527_v62  ;;  %vm785_vm6 = vmor %vm783_vm4, %vm784_vm1  ;;  %v828_v52 = vand.u32 2147483648, %v816_v54 }
 0x179   :  { %v780_v63 = vsub.f32 1.0, %v779_v45  ;;  %vm804_vm7 = vmor %vm802_vm5, %vm803_vm3  ;;  %v826_v53 = vand.u32 2147483647, %v816_v54 }
 0x17a   :  { %v799_v61 = vsub.f32 1.0, %v798_v46 }
 0x17b   :  { %v781_v48 = vmul.f32 %v1525_v59, %v780_v63  ;;  %vm827_vm13 = vcmp.eq.f32.partialorder %v826_v53, 8.507059e+37 }
 0x17c   :  { %v800_v7 = vmul.f32 %v1527_v62, %v799_v61 }
 0x17d   :  { %v1529_v51 = vpop.eup %1528  ;;  %v782_v11 = vadd.f32 %v1525_v59, %v781_v48 }
 0x17e   :  { %v801_v57 = vadd.f32 %v1527_v62, %v800_v7  ;;  %v818_v16 = vmul.f32 %v1529_v51, %v816_v54  ;;  %v1531_v20 = vpop.eup %1530  ;;  %vm823_vm10 = vweird.f32 %v1529_v51 }
 0x17f   :  { %v786_v19 = vsel %vm785_vm6, %v1525_v59, %v782_v11  ;;  %vm824_vm12 = vmor %vm822_vm11, %vm823_vm10  ;;  %v829_v59 = vor.u32 1.1754944e-38, %v828_v52 }
 0x180   :  { %v791_v21 = vsel %vm788_vm8, %v790_v60, %v786_v19  ;;  %v805_v22 = vsel %vm804_vm7, %v1527_v62, %v801_v57  ;;  %v819_v29 = vsub.f32 1.0, %v818_v16 }
 0x181   :  { %v810_v32 = vsel %vm807_vm9, %v809_v6, %v805_v22  ;;  %v833_v39 = vmul.f32 %v1531_v20, %v791_v21 }
 0x182   :  { %v832_v50 = vmul.f32 %v810_v32, %v1916_v10  ;;  %v820_v56 = vmul.f32 %v1529_v51, %v819_v29 }
 0x184   :  { %v1944_v44 = vadd.f32 %v833_v39, %v832_v50  ;;  %v821_v47 = vadd.f32 %v1529_v51, %v820_v56 }
 0x186   :  { %1532 = vtanh.f32 %v1944_v44  ;;  %v825_v58 = vsel %vm824_vm12, %v1529_v51, %v821_v47 }
 0x187   :  { %v830_v62 = vsel %vm827_vm13, %v829_v59, %v825_v58 }
 0x18c   :  { %v1533_v55 = vpop.eup %1532 }
 0x18d   :  { %v836_v45 = vmul.f32 %v1533_v55, %v830_v62 }
 0x18f   :  { %1466 = vmatmul.msk.f32.vlgmr.msrb.gmra.mxu0 %vm536_vm15, %v836_v45  ;;  %1467 = vmatmul.msk.f32.vlgmr.msrb.gmra.mxu1 %vm536_vm15, %v836_v45 }
 0x190   :  { %1468 = vmatmul.msk.f32.vlgmr.msrb.gmra.mxu2 %vm536_vm15, %v836_v45  ;;  %1469 = vmatmul.msk.f32.vlgmr.msrb.gmra.mxu3 %vm536_vm15, %v836_v45 }
 0x191   :  { %1152 = vmatpush.msrb.mxu0 %v1792_v25  ;;  %1172 = vmatpush.msrb.mxu1 %v1794_v26 }
 0x192   :  { %1192 = vmatpush.msrb.mxu2 %v1798_v27  ;;  %1212 = vmatpush.msrb.mxu3 %v1800_v28 }
 0x193   :  { %1153 = vmatpush.msrb.mxu0 %v1804_v30  ;;  %1173 = vmatpush.msrb.mxu1 %v1806_v31 }
 0x194   :  { %1193 = vmatpush.msrb.mxu2 %v1813_v33  ;;  %1213 = vmatpush.msrb.mxu3 %v1815_v34 }
 0x195   :  { %1154 = vmatpush.msrb.mxu0 %v1819_v35  ;;  %1174 = vmatpush.msrb.mxu1 %v1821_v36 }
 0x196   :  { %1194 = vmatpush.msrb.mxu2 %v1825_v37  ;;  %1214 = vmatpush.msrb.mxu3 %v1827_v38 }
 0x197   :  { %1155 = vmatpush.msrb.mxu0 %v1836_v40  ;;  %1175 = vmatpush.msrb.mxu1 %v1838_v41 }
 0x198   :  { %1195 = vmatpush.msrb.mxu2 %v1842_v42  ;;  %1215 = vmatpush.msrb.mxu3 %v1844_v43 }
 0x20c   :  { %v857_v25 = vpop.f32.mrf.mxu0  ;;  %v877_v26 = vpop.f32.mrf.mxu1 }
 0x20d   :  { %v920_v27 = vadd.f32 %v857_v25, %v1892_v0  ;;  %v921_v28 = vadd.f32 %v877_v26, %v1894_v1 }
 0x20f   :  { %v1470_v30 = vmul.f32 -1.442695, %v920_v27  ;;  %v1471_v31 = vmul.f32 -1.442695, %v921_v28 }
 0x211   :  { %1534 = vpow2.f32 %v1470_v30 }
 0x212   :  { %1536 = vpow2.f32 %v1471_v31 }
 0x213   :  { %v917_v33 = vpop.f32.mrf.mxu3  ;;  %v897_v41 = vpop.f32.mrf.mxu2 }
 0x214   :  { %v923_v34 = vadd.f32 %v917_v33, %v1898_v5  ;;  %v922_v1 = vadd.f32 %v897_v41, %v1896_v4 }
 0x216   :  { %v1472_v35 = vmul.f32 -1.442695, %v923_v34 }
 0x217   :  { %v1535_v36 = vpop.eup %1534 }
 0x218   :  { %v1537_v37 = vpop.eup %1536  ;;  %v927_v38 = vadd.f32 1.0, %v1535_v36  ;;  %1538 = vpow2.f32 %v1472_v35 }
 0x219   :  { %v946_v40 = vadd.f32 1.0, %v1537_v37 }
 0x21a   :  { %1540 = vrcp.f32 %v927_v38  ;;  %v939_v61 = vand.u32 2147483648, %v927_v38  ;;  %v937_v48 = vand.u32 2147483647, %v927_v38  ;;  %vm933_vm3 = vweird.f32 %v927_v38 }
 0x21b   :  { %1542 = vrcp.f32 %v946_v40  ;;  %v958_v2 = vand.u32 2147483648, %v946_v40  ;;  %v956_v7 = vand.u32 2147483647, %v946_v40  ;;  %vm952_vm4 = vweird.f32 %v946_v40 }
 0x21c   :  { %v940_v4 = vor.u32 1.1754944e-38, %v939_v61  ;;  %vm938_vm7 = vcmp.eq.f32.partialorder %v937_v48, 8.507059e+37 }
 0x21d   :  { %v959_v57 = vor.u32 1.1754944e-38, %v958_v2  ;;  %vm957_vm8 = vcmp.eq.f32.partialorder %v956_v7, 8.507059e+37 }
 0x21e   :  { %v1539_v42 = vpop.eup %1538 }
 0x21f   :  { %v966_v43 = vadd.f32 1.0, %v1539_v42 }
 0x220   :  { %v1541_v0 = vpop.eup %1540 }
 0x221   :  { %v1543_v10 = vpop.eup %1542  ;;  %v929_v54 = vmul.f32 %v1541_v0, %v927_v38  ;;  %1544 = vrcp.f32 %v966_v43  ;;  %vm934_vm14 = vweird.f32 %v1541_v0  ;;  %v978_v47 = vand.u32 2147483648, %v966_v43 }
 0x222   :  { %v948_v46 = vmul.f32 %v1543_v10, %v946_v40  ;;  %1546 = vtanh.f32 %v922_v1  ;;  %vm953_vm1 = vweird.f32 %v1543_v10  ;;  %vm935_vm5 = vmor %vm933_vm3, %vm934_vm14  ;;  %vm972_vm10 = vweird.f32 %v966_v43 }
 0x223   :  { %v930_v63 = vsub.f32 1.0, %v929_v54  ;;  %vm954_vm6 = vmor %vm952_vm4, %vm953_vm1  ;;  %v976_v52 = vand.u32 2147483647, %v966_v43  ;;  %v979_v58 = vor.u32 1.1754944e-38, %v978_v47 }
 0x224   :  { %v949_v5 = vsub.f32 1.0, %v948_v46 }
 0x225   :  { %v931_v3 = vmul.f32 %v1541_v0, %v930_v63  ;;  %vm977_vm12 = vcmp.eq.f32.partialorder %v976_v52, 8.507059e+37 }
 0x226   :  { %v950_v49 = vmul.f32 %v1543_v10, %v949_v5 }
 0x227   :  { %v1545_v15 = vpop.eup %1544  ;;  %v932_v51 = vadd.f32 %v1541_v0, %v931_v3 }
 0x228   :  { %v951_v11 = vadd.f32 %v1543_v10, %v950_v49  ;;  %v968_v60 = vmul.f32 %v1545_v15, %v966_v43  ;;  %v1547_v6 = vpop.eup %1546  ;;  %vm973_vm9 = vweird.f32 %v1545_v15 }
 0x229   :  { %v936_v16 = vsel %vm935_vm5, %v1541_v0, %v932_v51  ;;  %vm974_vm11 = vmor %vm972_vm10, %vm973_vm9 }
 0x22a   :  { %v941_v19 = vsel %vm938_vm7, %v940_v4, %v936_v16  ;;  %v955_v20 = vsel %vm954_vm6, %v1543_v10, %v951_v11  ;;  %v969_v21 = vsub.f32 1.0, %v968_v60 }
 0x22b   :  { %v960_v22 = vsel %vm957_vm8, %v959_v57, %v955_v20  ;;  %v983_v29 = vmul.f32 %v1547_v6, %v941_v19 }
 0x22c   :  { %v982_v32 = vmul.f32 %v960_v22, %v1944_v44  ;;  %v970_v39 = vmul.f32 %v1545_v15, %v969_v21 }
 0x22e   :  { %v1972_v50 = vadd.f32 %v983_v29, %v982_v32  ;;  %v971_v56 = vadd.f32 %v1545_v15, %v970_v39 }
 0x230   :  { %1548 = vtanh.f32 %v1972_v50  ;;  %v975_v53 = vsel %vm974_vm11, %v1545_v15, %v971_v56 }
 0x231   :  { %v980_v55 = vsel %vm977_vm12, %v979_v58, %v975_v53 }
 0x236   :  { %v1549_v59 = vpop.eup %1548 }
 0x237   :  { %v986_v62 = vmul.f32 %v1549_v59, %v980_v55 }
 0x239   :  { %1473 = vmatmul.msk.f32.vlgmr.msra.gmra.mxu0 %vm536_vm15, %v986_v62  ;;  %1474 = vmatmul.msk.f32.vlgmr.msra.gmra.mxu1 %vm536_vm15, %v986_v62 }
 0x23a   :  { %1475 = vmatmul.msk.f32.vlgmr.msra.gmra.mxu2 %vm536_vm15, %v986_v62  ;;  %1476 = vmatmul.msk.f32.vlgmr.msra.gmra.mxu3 %vm536_vm15, %v986_v62 }
 0x2b6   :  { %v1007_v44 = vpop.f32.mrf.mxu0  ;;  %v1027_v45 = vpop.f32.mrf.mxu1 }
 0x2b7   :  { %v1070_v25 = vadd.f32 %v1007_v44, %v1900_v8  ;;  %v1071_v26 = vadd.f32 %v1027_v45, %v1902_v9  ;;  %v1292_v44 = vld [vmem:[#allocation4 + $0x28] sm:$0xff] }
 0x2b8   :  { %v1288_v45 = vld [vmem:[#allocation4 + $0x8] sm:$0x1f]  ;;  %1309 = vmatpush.msra.mxu0 %v1292_v44 }
 0x2b9   :  { %v1477_v27 = vmul.f32 -1.442695, %v1070_v25  ;;  %v1478_v28 = vmul.f32 -1.442695, %v1071_v26  ;;  %v1291_v25 = vld [vmem:[#allocation4 + $0x20] sm:$0xff]  ;;  %1488 = vmatpush.msk.msra.mxu1 %vm75_vm0, %v1288_v45  ;;  %v1374_v45 = vld [vmem:[#allocation4 + $0x68] sm:$0xff] }
 0x2ba   :  { %v1287_v26 = vld [vmem:[#allocation4] sm:$0xff]  ;;  %1310 = vmatpush.msra.mxu0 %v1291_v25 }
 0x2bb   :  { %1550 = vpow2.f32 %v1477_v27  ;;  %v1290_v27 = vld [vmem:[#allocation4 + $0x18] sm:$0xff]  ;;  %1335 = vmatpush.msra.mxu1 %v1287_v26  ;;  %v1373_v25 = vld [vmem:[#allocation4 + $0x60] sm:$0xff] }
 0x2bc   :  { %1552 = vpow2.f32 %v1478_v28  ;;  %1311 = vmatpush.msra.mxu0 %v1290_v27  ;;  %v1500_v26 = vld [vmem:[#allocation4 + $0x58] ss:$0 sm:$0xff] }
 0x2bd   :  { %v1067_v30 = vpop.f32.mrf.mxu3  ;;  %v1047_v38 = vpop.f32.mrf.mxu2 }
 0x2be   :  { %v1073_v31 = vadd.f32 %v1067_v30, %v1906_v14  ;;  %v1072_v9 = vadd.f32 %v1047_v38, %v1904_v13 }
 0x2c0   :  { %v1479_v33 = vmul.f32 -1.442695, %v1073_v31 }
 0x2c1   :  { %v1551_v34 = vpop.eup %1550 }
 0x2c2   :  { %v1553_v35 = vpop.eup %1552  ;;  %v1077_v36 = vadd.f32 1.0, %v1551_v34  ;;  %1554 = vpow2.f32 %v1479_v33 }
 0x2c3   :  { %v1096_v37 = vadd.f32 1.0, %v1553_v35 }
 0x2c4   :  { %1556 = vrcp.f32 %v1077_v36  ;;  %v1089_v10 = vand.u32 2147483648, %v1077_v36  ;;  %v1087_v63 = vand.u32 2147483647, %v1077_v36  ;;  %vm1083_vm1 = vweird.f32 %v1077_v36 }
 0x2c5   :  { %1558 = vrcp.f32 %v1096_v37  ;;  %v1108_v54 = vand.u32 2147483648, %v1096_v37  ;;  %v1106_v61 = vand.u32 2147483647, %v1096_v37  ;;  %vm1102_vm3 = vweird.f32 %v1096_v37 }
 0x2c6   :  { %v1090_v13 = vor.u32 1.1754944e-38, %v1089_v10  ;;  %vm1088_vm6 = vcmp.eq.f32.partialorder %v1087_v63, 8.507059e+37 }
 0x2c7   :  { %v1109_v7 = vor.u32 1.1754944e-38, %v1108_v54  ;;  %vm1107_vm7 = vcmp.eq.f32.partialorder %v1106_v61, 8.507059e+37 }
 0x2c8   :  { %v1555_v40 = vpop.eup %1554 }
 0x2c9   :  { %v1116_v8 = vadd.f32 1.0, %v1555_v40 }
 0x2ca   :  { %v1557_v41 = vpop.eup %1556 }
 0x2cb   :  { %v1559_v42 = vpop.eup %1558  ;;  %v1079_v43 = vmul.f32 %v1557_v41, %v1077_v36  ;;  %1560 = vrcp.f32 %v1116_v8  ;;  %vm1084_vm13 = vweird.f32 %v1557_v41  ;;  %v1128_v22 = vand.u32 2147483648, %v1116_v8  ;;  %v1346_v36 = vld [vmem:[#allocation4 + $0x50] sm:$0xff] }
 0x2cc   :  { %v1098_v0 = vmul.f32 %v1559_v42, %v1096_v37  ;;  %1562 = vtanh.f32 %v1072_v9  ;;  %vm1103_vm14 = vweird.f32 %v1559_v42  ;;  %vm1085_vm4 = vmor %vm1083_vm1, %vm1084_vm13  ;;  %vm1122_vm9 = vweird.f32 %v1116_v8  ;;  %1364 = vmatpush.msra.mxu2 %v1346_v36 }
 0x2cd   :  { %v1080_v1 = vsub.f32 1.0, %v1079_v43  ;;  %vm1104_vm5 = vmor %vm1102_vm3, %vm1103_vm14  ;;  %v1126_v29 = vand.u32 2147483647, %v1116_v8  ;;  %v1129_v39 = vor.u32 1.1754944e-38, %v1128_v22 }
 0x2ce   :  { %v1099_v14 = vsub.f32 1.0, %v1098_v0 }
 0x2cf   :  { %v1081_v46 = vmul.f32 %v1557_v41, %v1080_v1  ;;  %vm1127_vm11 = vcmp.eq.f32.partialorder %v1126_v29, 8.507059e+37 }
 0x2d0   :  { %v1100_v5 = vmul.f32 %v1559_v42, %v1099_v14 }
 0x2d1   :  { %v1561_v2 = vpop.eup %1560  ;;  %v1082_v3 = vadd.f32 %v1557_v41, %v1081_v46 }
 0x2d2   :  { %v1101_v48 = vadd.f32 %v1559_v42, %v1100_v5  ;;  %v1118_v49 = vmul.f32 %v1561_v2, %v1116_v8  ;;  %v1563_v51 = vpop.eup %1562  ;;  %vm1123_vm8 = vweird.f32 %v1561_v2 }
 0x2d3   :  { %v1086_v15 = vsel %vm1085_vm4, %v1557_v41, %v1082_v3  ;;  %vm1124_vm10 = vmor %vm1122_vm9, %vm1123_vm8 }
 0x2d4   :  { %v1091_v4 = vsel %vm1088_vm6, %v1090_v13, %v1086_v15  ;;  %v1105_v11 = vsel %vm1104_vm5, %v1559_v42, %v1101_v48  ;;  %v1119_v60 = vsub.f32 1.0, %v1118_v49 }
 0x2d5   :  { %v1110_v57 = vsel %vm1107_vm7, %v1109_v7, %v1105_v11  ;;  %v1133_v16 = vmul.f32 %v1563_v51, %v1091_v4 }
 0x2d6   :  { %v1132_v6 = vmul.f32 %v1110_v57, %v1972_v50  ;;  %v1120_v19 = vmul.f32 %v1561_v2, %v1119_v60 }
 0x2d8   :  { %v1984_v20 = vadd.f32 %v1133_v16, %v1132_v6  ;;  %v1121_v21 = vadd.f32 %v1561_v2, %v1120_v19 }
 0x2da   :  { %1564 = vtanh.f32 %v1984_v20  ;;  %v1125_v32 = vsel %vm1124_vm10, %v1561_v2, %v1121_v21  ;;  %vm1408_vm10 = vcmask 25600  }
 0x2db   :  { %v1130_v47 = vsel %vm1127_vm11, %v1129_v39, %v1125_v32 }
 0x2e0   :  { %v1565_v56 = vpop.eup %1564 }
 0x2e1   :  { %v1136_v52 = vmul.f32 %v1565_v56, %v1130_v47  ;;  %v1345_v56 = vld [vmem:[#allocation4 + $0x48] sm:$0xff]  ;;  %v1343_v47 = vld [vmem:[#allocation4 + $0x38] sm:$0xff] }
 0x2e2   :  { %1365 = vmatpush.msra.mxu2 %v1345_v56 }
 0x2e3   :  { %1480 = vmatmul.msk.f32.vlgmr.msrb.gmra.mxu0 %vm536_vm15, %v1136_v52  ;;  %1481 = vmatmul.msk.f32.vlgmr.msrb.gmra.mxu1 %vm536_vm15, %v1136_v52 }
 0x2e4   :  { %1482 = vmatmul.msk.f32.vlgmr.msrb.gmra.mxu2 %vm536_vm15, %v1136_v52  ;;  %1483 = vmatmul.msk.f32.vlgmr.msrb.gmra.mxu3 %vm536_vm15, %v1136_v52  ;;  %v1376_v52 = vld [vmem:[#allocation4 + $0x78] sm:$0xff] }
 0x2e5   :  { %1394 = vmatpush.msra.mxu3 %v1376_v52 }
 0x2eb   :  { %1489 = vmatmul.msk.f32.vlgmr.msra.gmra.mxu1 %vm72_vm2, %v1709_v12 }
 0x360   :  { %v1157_v50 = vpop.f32.mrf.mxu0  ;;  %v1177_v53 = vpop.f32.mrf.mxu1 }
 0x361   :  { %v1220_v58 = vadd.f32 %v1157_v50, %v1908_v17  ;;  %v1221_v59 = vadd.f32 %v1177_v53, %v1910_v18  ;;  %v1289_v17 = vld [vmem:[#allocation4 + $0x10] sm:$0xff] }
 0x362   :  { %1312 = vmatpush.msra.mxu0 %v1289_v17  ;;  %v1375_v50 = vld [vmem:[#allocation4 + $0x70] sm:$0xff]  ;;  %v1402_v17 = vlaneseq }
 0x363   :  { %v1484_v55 = vmul.f32 -1.442695, %v1220_v58  ;;  %v1485_v62 = vmul.f32 -1.442695, %v1221_v59  ;;  %1395 = vmatpush.msra.mxu3 %v1375_v50  ;;  %v1499_v58 = vld [vmem:[#allocation4 + $0x30] ss:$0 sm:$0xff] }
 0x365   :  { %1566 = vpow2.f32 %v1484_v55  ;;  %1396 = vmatpush.msra.mxu3 %v1374_v45 }
 0x366   :  { %1568 = vpow2.f32 %v1485_v62 }
 0x367   :  { %v1217_v28 = vpop.f32.mrf.mxu3  ;;  %v1197_v37 = vpop.f32.mrf.mxu2  ;;  %1397 = vmatpush.msra.mxu3 %v1373_v25 }
 0x368   :  { %v1223_v30 = vadd.f32 %v1217_v28, %v1914_v24  ;;  %v1222_v8 = vadd.f32 %v1197_v37, %v1912_v23  ;;  %v1337_v53 = vpop.f32.mrf.mxu1 }
 0x36a   :  { %v1486_v18 = vmul.f32 -1.442695, %v1223_v30 }
 0x36b   :  { %v1567_v31 = vpop.eup %1566 }
 0x36c   :  { %v1569_v33 = vpop.eup %1568  ;;  %v1227_v34 = vadd.f32 1.0, %v1567_v31  ;;  %1570 = vpow2.f32 %v1486_v18  ;;  %v1501_v18 = vld [vmem:[#allocation4 + $0x80] ss:$0 sm:$0xff] }
 0x36d   :  { %v1246_v35 = vadd.f32 1.0, %v1569_v33  ;;  %v1403_v33 = vand.u32 127, %v1402_v17 }
 0x36e   :  { %1572 = vrcp.f32 %v1227_v34  ;;  %v1239_v0 = vand.u32 2147483648, %v1227_v34  ;;  %v1237_v10 = vand.u32 2147483647, %v1227_v34  ;;  %vm1233_vm12 = vweird.f32 %v1227_v34 }
 0x36f   :  { %1574 = vrcp.f32 %v1246_v35  ;;  %v1258_v1 = vand.u32 2147483648, %v1246_v35  ;;  %v1256_v46 = vand.u32 2147483647, %v1246_v35  ;;  %vm1252_vm13 = vweird.f32 %v1246_v35 }
 0x370   :  { %v1240_v23 = vor.u32 1.1754944e-38, %v1239_v0  ;;  %vm1238_vm3 = vcmp.eq.f32.partialorder %v1237_v10, 8.507059e+37  ;;  %vm1404_vm9 = vcmp.ge.s32.totalorder %v1403_v33, 2 }
 0x371   :  { %v1259_v3 = vor.u32 1.1754944e-38, %v1258_v1  ;;  %vm1257_vm4 = vcmp.eq.f32.partialorder %v1256_v46, 8.507059e+37 }
 0x372   :  { %v1571_v38 = vpop.eup %1570 }
 0x373   :  { %v1266_v40 = vadd.f32 1.0, %v1571_v38 }
 0x374   :  { %v1573_v24 = vpop.eup %1572 }
 0x375   :  { %v1575_v41 = vpop.eup %1574  ;;  %v1229_v12 = vmul.f32 %v1573_v24, %v1227_v34  ;;  %1576 = vrcp.f32 %v1266_v40  ;;  %vm1234_vm0 = vweird.f32 %v1573_v24  ;;  %v1278_v6 = vand.u32 2147483648, %v1266_v40 }
 0x376   :  { %v1248_v9 = vmul.f32 %v1575_v41, %v1246_v35  ;;  %1578 = vtanh.f32 %v1222_v8  ;;  %vm1253_vm2 = vweird.f32 %v1575_v41  ;;  %vm1235_vm14 = vmor %vm1233_vm12, %vm1234_vm0  ;;  %vm1272_vm6 = vweird.f32 %v1266_v40 }
 0x377   :  { %v1230_v42 = vsub.f32 1.0, %v1229_v12  ;;  %vm1254_vm1 = vmor %vm1252_vm13, %vm1253_vm2  ;;  %v1276_v19 = vand.u32 2147483647, %v1266_v40  ;;  %v1279_v22 = vor.u32 1.1754944e-38, %v1278_v6 }
 0x378   :  { %v1249_v43 = vsub.f32 1.0, %v1248_v9 }
 0x379   :  { %v1231_v14 = vmul.f32 %v1573_v24, %v1230_v42  ;;  %vm1277_vm8 = vcmp.eq.f32.partialorder %v1276_v19, 8.507059e+37 }
 0x37a   :  { %v1250_v54 = vmul.f32 %v1575_v41, %v1249_v43 }
 0x37b   :  { %v1577_v63 = vpop.eup %1576  ;;  %v1232_v5 = vadd.f32 %v1573_v24, %v1231_v14 }
 0x37c   :  { %v1251_v61 = vadd.f32 %v1575_v41, %v1250_v54  ;;  %v1268_v2 = vmul.f32 %v1577_v63, %v1266_v40  ;;  %v1579_v48 = vpop.eup %1578  ;;  %vm1273_vm5 = vweird.f32 %v1577_v63 }
 0x37d   :  { %v1236_v13 = vsel %vm1235_vm14, %v1573_v24, %v1232_v5  ;;  %vm1274_vm7 = vmor %vm1272_vm6, %vm1273_vm5 }
 0x37e   :  { %v1241_v49 = vsel %vm1238_vm3, %v1240_v23, %v1236_v13  ;;  %v1255_v7 = vsel %vm1254_vm1, %v1575_v41, %v1251_v61  ;;  %v1269_v15 = vsub.f32 1.0, %v1268_v2 }
 0x37f   :  { %v1260_v51 = vsel %vm1257_vm4, %v1259_v3, %v1255_v7  ;;  %v1283_v4 = vmul.f32 %v1579_v48, %v1241_v49 }
 0x380   :  { %v1282_v11 = vmul.f32 %v1260_v51, %v1984_v20  ;;  %v1270_v60 = vmul.f32 %v1577_v63, %v1269_v15  ;;  %v1344_v20 = vld [vmem:[#allocation4 + $0x40] sm:$0xff] }
 0x381   :  { %1366 = vmatpush.msra.mxu2 %v1344_v20 }
 0x382   :  { %v1284_v57 = vadd.f32 %v1283_v4, %v1282_v11  ;;  %v1271_v16 = vadd.f32 %v1577_v63, %v1270_v60 }
 0x383   :  { %1367 = vmatpush.msra.mxu2 %v1343_v47 }
 0x384   :  { %1580 = vtanh.f32 %v1284_v57  ;;  %v1275_v21 = vsel %vm1274_vm7, %v1577_v63, %v1271_v16 }
 0x385   :  { %v1280_v32 = vsel %vm1277_vm8, %v1279_v22, %v1275_v21 }
 0x38a   :  { %v1581_v29 = vpop.eup %1580 }
 0x38b   :  { %v1286_v39 = vmul.f32 %v1581_v29, %v1280_v32 }
 0x38d   :  { %1487 = vmatmul.msk.f32.vlgmr.msra.gmra.mxu0 %vm536_vm15, %v1286_v39 }
 0x40a   :  { %v1314_v59 = vpop.f32.mrf.mxu0 }
 0x40b   :  { %v1338_v55 = vadd.f32 %v1337_v53, %v1314_v59 }
 0x40d   :  { %v1341_v62 = vadd.f32 %v1499_v58, %v1338_v55 }
 0x40f   :  { %v1342_v44 = vmax.f32 %v1341_v62, 0.0 }
 0x411   :  { %1490 = vmatmul.msk.f32.vlgmr.msra.gmra.mxu2 %vm536_vm15, %v1342_v44 }
 0x494   :  { %v1369_v27 = vpop.f32.mrf.mxu2 }
 0x495   :  { %v1370_v28 = vadd.f32 %v1500_v26, %v1369_v27 }
 0x497   :  { %v1372_v30 = vmax.f32 %v1370_v28, 0.0 }
 0x499   :  { %1491 = vmatmul.msk.f32.vlgmr.msra.gmra.mxu3 %vm536_vm15, %v1372_v30 }
 0x51c   :  { %v1399_v31 = vpop.f32.mrf.mxu3 }
 0x51d   :  { %v1400_v34 = vadd.f32 %v1501_v18, %v1399_v31 }
 0x51f   :  { %v1405_v35 = vmax.f32 %v1400_v34, -20.0 }
 0x521   :  { %v1406_v36 = vmin.f32 %v1405_v35, 2.0 }
 0x523   :  { %v1407_v37 = vsel %vm1404_vm9, %v1406_v36, %v1400_v34 }
 0x524   :  { %1409 = vst.msk [vmem:[%s2008_s3] sm:$0x3] %vm1408_vm10, %v1407_v37 }
 0x525   :  { %1414 = vsyncpa [#allocation3], 1 }
 0x526   :  { %1415 = vsyncpa [#allocation5], 1 }

</bundles_post_ra>
